<compile_context>
chip_gen: v5e
topology: v5e:2x2
jax: 0.10.0
libtpu: 0.0.40
codegen_flags: <defaults>
</compile_context>

<pallas_src>
from functools import partial

import jax
import jax.numpy as jnp
from jax import lax
from jax.experimental import pallas as pl
from jax.experimental.pallas import tpu as pltpu

EPS = 1e-5


# ----------------------------- in-kernel helpers -----------------------------

def _layernorm(x, g, b):
    mu = jnp.mean(x, axis=-1, keepdims=True)
    var = jnp.mean((x - mu) ** 2, axis=-1, keepdims=True)
    return (x - mu) * lax.rsqrt(var + EPS) * g + b


def _silu(x):
    return x * jax.nn.sigmoid(x)


# ----------------------------- fused Pallas kernel ----------------------------

def _make_fused_kernel(heads, dim_head, inner0, inner):
    HDh = heads * dim_head

    def kernel(x_ref, ew1_ref, eb1_ref, ew2_ref, eb2_ref, rot_ref, fin_ref,
               attn_w_ref, wo_ref, ffw1_ref, ffw2_ref, vecs_ref, ffb1_ref,
               o_ref):
        l = pl.program_id(1)

        # ----- initial embedding FeedForward (GLU-SiLU): first depth step of each batch.
        # TODO(synk): at production sizes run this as a prologue step so its weights are not
        # VMEM-resident for every layer iteration.
        @pl.when(l == 0)
        def _():
            x = x_ref[0]                                                      # (S, Din) f32
            z = jnp.dot(x, ew1_ref[...], preferred_element_type=jnp.float32) + eb1_ref[...]
            val, gate = z[:, :inner0], z[:, inner0:]
            o_ref[0] = jnp.dot(val * _silu(gate), ew2_ref[...],
                               preferred_element_type=jnp.float32) + eb2_ref[...]

        res = o_ref[0]                                                        # resident residual (S, D)

        # ----- attention block:  res + Wo @ softmax(rot(q) rot(k)^T) v   (no mask: one batch/block)
        h = _layernorm(res, vecs_ref[0, 0], vecs_ref[0, 1])
        proj = jnp.dot(h.astype(jnp.bfloat16), attn_w_ref[0],                 # ONE packed proj dot
                       preferred_element_type=jnp.float32)                    # (S, 5*H*Dh) f32
        # rotary-xpos (attention scale folded into rot[0]/rot[1]); tables are head-tiled.
        q = proj[:, 0 * HDh:1 * HDh] * rot_ref[0] + proj[:, 1 * HDh:2 * HDh] * rot_ref[1]
        k = proj[:, 2 * HDh:3 * HDh] * rot_ref[2] + proj[:, 3 * HDh:4 * HDh] * rot_ref[3]
        v = proj[:, 4 * HDh:5 * HDh]

        pvs = []
        for hd in range(heads):                                               # static unroll, tiny 2-D dots
            sl = slice(hd * dim_head, (hd + 1) * dim_head)
            logits = jnp.dot(q[:, sl], k[:, sl].T, preferred_element_type=jnp.float32)
            logits = logits - jnp.max(logits, axis=-1, keepdims=True)
            p = jnp.exp(logits)
            p = p * pl.reciprocal(jnp.sum(p, axis=-1, keepdims=True), approx=True)
            pvs.append(jnp.dot(p, v[:, sl], preferred_element_type=jnp.float32))
        pv = jnp.concatenate(pvs, axis=-1)                                    # (S, H*Dh)
        res = res + jnp.dot(pv.astype(jnp.bfloat16), wo_ref[0],               # ONE packed out dot
                            preferred_element_type=jnp.float32)

        # ----- feed-forward block (GLU-SiLU), pre-norm, residual
        h2 = _layernorm(res, vecs_ref[0, 2], vecs_ref[0, 3])
        z = jnp.dot(h2.astype(jnp.bfloat16), ffw1_ref[0],
                    preferred_element_type=jnp.float32) + ffb1_ref[0]
        val, gate = z[:, :inner], z[:, inner:]
        res = res + jnp.dot((val * _silu(gate)).astype(jnp.bfloat16), ffw2_ref[0],
                            preferred_element_type=jnp.float32) + vecs_ref[0, 4]

        o_ref[0] = res

        # ----- final LayerNorm after the last layer
        @pl.when(l == pl.num_programs(1) - 1)
        def _():
            o_ref[0] = _layernorm(o_ref[0], fin_ref[0], fin_ref[1])

    return kernel


# ----------------------------- BlockSpec helpers -------------------------------

def _const_spec(a):
    nd = a.ndim
    return pl.BlockSpec(tuple(a.shape), lambda b, l, _n=nd: (0,) * _n)


def _layer_spec(a):
    nd = a.ndim
    return pl.BlockSpec((1,) + tuple(a.shape[1:]),
                        lambda b, l, _n=nd: (l,) + (0,) * (_n - 1))


# ----------------------------- host-side prep (weights / tables) ---------------

def _rotary_tables(S, dim_head, heads, scale_base=256.0, attn_scale=1.0):
    """cos/sin tables in half-split layout with rotate_half sign, xpos scales and the attention
    1/sqrt(dim_head) scale (q side) folded in; head-tiled to (S, heads*dim_head)."""
    half = dim_head // 2
    inv_freq = 1.0 / (10000.0 ** (jnp.arange(0, dim_head, 2, dtype=jnp.float32) / dim_head))
    t = jnp.arange(S, dtype=jnp.float32)
    freqs = t[:, None] * inv_freq[None, :]                       # (S, Dh/2)
    freqs = jnp.concatenate([freqs, freqs], axis=-1)             # (S, Dh)
    cos, sin = jnp.cos(freqs), jnp.sin(freqs)
    base = (jnp.arange(0, dim_head, 2, dtype=jnp.float32) + 0.4 * dim_head) / (1.4 * dim_head)
    power = (t - S // 2) / scale_base
    xscale = base[None, :] ** power[:, None]                     # (S, Dh/2)
    xscale = jnp.concatenate([xscale, xscale], axis=-1)          # (S, Dh)
    sign = jnp.concatenate([-jnp.ones((half,), jnp.float32), jnp.ones((half,), jnp.float32)])
    cos_q = cos * xscale * attn_scale
    sin_q = sin * sign[None, :] * xscale * attn_scale
    cos_k = cos / xscale
    sin_k = sin * sign[None, :] / xscale
    tile = lambda a: jnp.tile(a, (1, heads))                     # head-major packed (S, H*Dh)
    return tile(cos_q), tile(sin_q), tile(cos_k), tile(sin_k)


def _prep_qk_weight(w, heads, dim_head):
    """Fold the interleaved-pair rotary convention and the rotate_half shuffle into the
    projection weights; returns head-packed (D, H*Dh) matrices (w_perm, w_shift)."""
    half = dim_head // 2
    D = w.shape[0]
    w3 = w.reshape(D, heads, dim_head)
    perm = jnp.concatenate([jnp.arange(0, dim_head, 2), jnp.arange(1, dim_head, 2)])
    w_p = w3[:, :, perm]                                # interleaved -> half-split feature order
    w_s = jnp.roll(w_p, shift=-half, axis=-1)           # partner: (h @ w_s)[:,d] == (h @ w_p)[:,(d+half)%Dh]
    return w_p.reshape(D, heads * dim_head), w_s.reshape(D, heads * dim_head)


# ----------------------------- forward -----------------------------------------

@partial(jax.jit, static_argnames=("heads", "dim_head"))
def synthetic_motion_encoder_forward(params, x, *, heads, dim_head):
    # TODO(synk): dropout omitted (inference semantics, p effectively 0).
    B, S, Din = x.shape
    D = params["final_ln_g"].shape[-1]
    depth = len(params["layers"])
    HDh = heads * dim_head

    # ---- host-side prep (plain XLA, compiled once under jit) ----
    e = params["emb_ff"]
    inner0 = e["w2"].shape[0]

    cos_q, sin_q, cos_k, sin_k = _rotary_tables(S, dim_head, heads, scale_base=256.0,
                                                attn_scale=dim_head ** -0.5)
    rot = jnp.stack([cos_q, sin_q, cos_k, sin_k], axis=0)        # (4, S, H*Dh) f32
    fin = jnp.stack([params["final_ln_g"], params["final_ln_b"]], axis=0)   # (2, 1, D) f32

    attn_w_l, wo_l, ffw1_l, ffw2_l, vecs_l, ffb1_l = [], [], [], [], [], []
    for lyr in params["layers"]:
        wqp, wqs = _prep_qk_weight(lyr["wq"], heads, dim_head)
        wkp, wks = _prep_qk_weight(lyr["wk"], heads, dim_head)
        attn_w_l.append(jnp.concatenate([wqp, wqs, wkp, wks, lyr["wv"]], axis=-1))  # (D, 5*H*Dh)
        wo_l.append(lyr["wo"])                                                       # (H*Dh, D)
        ffw1_l.append(lyr["ff_w1"])                                                  # (D, 2*inner)
        ffw2_l.append(lyr["ff_w2"])                                                  # (inner, D)
        vecs_l.append(jnp.stack([lyr["ln1_g"], lyr["ln1_b"], lyr["ln2_g"],
                                 lyr["ln2_b"], lyr["ff_b2"]], axis=0))               # (5, 1, D)
        ffb1_l.append(lyr["ff_b1"])                                                  # (1, 2*inner)

    # Coalesced, depth-stacked slabs (6 streamed DMAs per grid step).  Matmul weights in bf16.
    attn_w = jnp.stack(attn_w_l, 0).astype(jnp.bfloat16)   # (depth, D, 5*H*Dh)
    wo = jnp.stack(wo_l, 0).astype(jnp.bfloat16)           # (depth, H*Dh, D)
    ffw1 = jnp.stack(ffw1_l, 0).astype(jnp.bfloat16)       # (depth, D, 2*inner)
    ffw2 = jnp.stack(ffw2_l, 0).astype(jnp.bfloat16)       # (depth, inner, D)
    vecs = jnp.stack(vecs_l, 0)                            # (depth, 5, 1, D) f32
    ffb1 = jnp.stack(ffb1_l, 0)                            # (depth, 1, 2*inner) f32
    inner = ffw2.shape[1]

    consts = [x, e["w1"], e["b1"], e["w2"], e["b2"], rot, fin]
    streamed = [attn_w, wo, ffw1, ffw2, vecs, ffb1]

    in_specs = ([pl.BlockSpec((1, S, Din), lambda b, l: (b, 0, 0))]       # per-batch input block
                + [_const_spec(a) for a in consts[1:]]
                + [_layer_spec(a) for a in streamed])

    out = pl.pallas_call(
        _make_fused_kernel(heads, dim_head, inner0, inner),
        out_shape=jax.ShapeDtypeStruct((B, S, D), jnp.float32),
        grid=(B, depth),                                   # batch parallel, depth sequential
        in_specs=in_specs,
        out_specs=pl.BlockSpec((1, S, D), lambda b, l: (b, 0, 0)),   # resident residual per batch
        compiler_params=pltpu.CompilerParams(
            dimension_semantics=("parallel", "arbitrary"),
            vmem_limit_bytes=32 * 1024 * 1024),
    )(*consts, *streamed)

    return out


# ----------------------------- parameters --------------------------------------

def _linear(key, fan_in, fan_out):
    return jax.random.normal(key, (fan_in, fan_out), jnp.float32) / jnp.sqrt(float(fan_in))


def init_params(key, input_dim, transformer_dim, depth, mult, heads, dim_head):
    inner0 = int(input_dim * mult)
    inner_l = int(transformer_dim * mult)
    attn_inner = heads * dim_head
    keys = iter(jax.random.split(key, 4 + depth * 6))

    params = {
        "emb_ff": {
            "w1": _linear(next(keys), input_dim, 2 * inner0),
            "b1": jnp.zeros((1, 2 * inner0), jnp.float32),
            "w2": _linear(next(keys), inner0, transformer_dim),
            "b2": jnp.zeros((1, transformer_dim), jnp.float32),
        },
        "layers": [],
        "final_ln_g": jnp.ones((1, transformer_dim), jnp.float32),
        "final_ln_b": jnp.zeros((1, transformer_dim), jnp.float32),
    }
    for _ in range(depth):
        params["layers"].append({
            "ln1_g": jnp.ones((1, transformer_dim), jnp.float32),
            "ln1_b": jnp.zeros((1, transformer_dim), jnp.float32),
            "wq": _linear(next(keys), transformer_dim, attn_inner),
            "wk": _linear(next(keys), transformer_dim, attn_inner),
            "wv": _linear(next(keys), transformer_dim, attn_inner),
            "wo": _linear(next(keys), attn_inner, transformer_dim),
            "ln2_g": jnp.ones((1, transformer_dim), jnp.float32),
            "ln2_b": jnp.zeros((1, transformer_dim), jnp.float32),
            "ff_w1": _linear(next(keys), transformer_dim, 2 * inner_l),
            "ff_b1": jnp.zeros((1, 2 * inner_l), jnp.float32),
            "ff_w2": _linear(next(keys), inner_l, transformer_dim),
            "ff_b2": jnp.zeros((1, transformer_dim), jnp.float32),
        })
    return params


# ----------------------------- demo ---------------------------------------------

if __name__ == "__main__":
    B, S = 2, 8
    input_dim, transformer_dim, depth, mult = 16, 32, 2, 2
    heads, dim_head = 4, 8

    key = jax.random.PRNGKey(0)
    kx, kp = jax.random.split(key)
    x = jax.random.normal(kx, (B, S, input_dim), dtype=jnp.float32)
    params = init_params(kp, input_dim, transformer_dim, depth, mult, heads, dim_head)

    out = synthetic_motion_encoder_forward(params, x, heads=heads, dim_head=dim_head)
    out = jax.block_until_ready(out)
    assert out.shape == (B, S, transformer_dim), out.shape
    assert jnp.all(jnp.isfinite(out))
    print("KERNEL_OK")
</pallas_src>

<mosaic_0001>
module attributes {stable_mosaic.version = 11 : i64} {
  func.func @kernel(%arg0: i32, %arg1: i32, %arg2: memref<1x8x16xf32, #tpu.memory_space<vmem>>, %arg3: memref<16x64xf32, #tpu.memory_space<vmem>>, %arg4: memref<1x64xf32, #tpu.memory_space<vmem>>, %arg5: memref<32x32xf32, #tpu.memory_space<vmem>>, %arg6: memref<1x32xf32, #tpu.memory_space<vmem>>, %arg7: memref<4x8x32xf32, #tpu.memory_space<vmem>>, %arg8: memref<2x1x32xf32, #tpu.memory_space<vmem>>, %arg9: memref<1x32x160xbf16, #tpu.memory_space<vmem>>, %arg10: memref<1x32x32xbf16, #tpu.memory_space<vmem>>, %arg11: memref<1x32x128xbf16, #tpu.memory_space<vmem>>, %arg12: memref<1x64x32xbf16, #tpu.memory_space<vmem>>, %arg13: memref<1x5x1x32xf32, #tpu.memory_space<vmem>>, %arg14: memref<1x1x128xf32, #tpu.memory_space<vmem>>, %arg15: memref<1x8x32xf32, #tpu.memory_space<vmem>>) attributes {dimension_semantics = [#tpu.dimension_semantics<parallel>, #tpu.dimension_semantics<arbitrary>], iteration_bounds = array<i64: 2, 2>, scalar_prefetch = 0 : i64, scratch_operands = 0 : i64, tpu.core_type = #tpu.core_type<tc>, window_params = [{transform_indices = @transform_0, window_bounds = array<i64: 1, 8, 16>}, {pipeline_mode = #tpu.pipeline_mode<synchronous>, transform_indices = @transform_1, window_bounds = array<i64: 16, 64>}, {pipeline_mode = #tpu.pipeline_mode<synchronous>, transform_indices = @transform_2, window_bounds = array<i64: 1, 64>}, {pipeline_mode = #tpu.pipeline_mode<synchronous>, transform_indices = @transform_3, window_bounds = array<i64: 32, 32>}, {pipeline_mode = #tpu.pipeline_mode<synchronous>, transform_indices = @transform_4, window_bounds = array<i64: 1, 32>}, {pipeline_mode = #tpu.pipeline_mode<synchronous>, transform_indices = @transform_5, window_bounds = array<i64: 4, 8, 32>}, {pipeline_mode = #tpu.pipeline_mode<synchronous>, transform_indices = @transform_6, window_bounds = array<i64: 2, 1, 32>}, {transform_indices = @transform_7, window_bounds = array<i64: 1, 32, 160>}, {transform_indices = @transform_8, window_bounds = array<i64: 1, 32, 32>}, {transform_indices = @transform_9, window_bounds = array<i64: 1, 32, 128>}, {transform_indices = @transform_10, window_bounds = array<i64: 1, 64, 32>}, {transform_indices = @transform_11, window_bounds = array<i64: 1, 5, 1, 32>}, {transform_indices = @transform_12, window_bounds = array<i64: 1, 1, 128>}, {transform_indices = @transform_13, window_bounds = array<i64: 1, 8, 32>}]} {
    %c0_i32 = arith.constant 0 : i32
    %0 = arith.cmpi eq, %arg1, %c0_i32 : i32
    %1 = arith.extui %0 : i1 to i32
    %c0_i32_0 = arith.constant 0 : i32
    %2 = arith.cmpi ne, %1, %c0_i32_0 : i32
    scf.if %2 {
      %c0_80 = arith.constant 0 : index
      %c0_81 = arith.constant 0 : index
      %c0_82 = arith.constant 0 : index
      %182 = vector.load %arg2[%c0_80, %c0_81, %c0_82] : memref<1x8x16xf32, #tpu.memory_space<vmem>>, vector<1x8x16xf32>
      %183 = vector.shape_cast %182 : vector<1x8x16xf32> to vector<8x16xf32>
      %c0_83 = arith.constant 0 : index
      %c0_84 = arith.constant 0 : index
      %184 = vector.load %arg3[%c0_83, %c0_84] : memref<16x64xf32, #tpu.memory_space<vmem>>, vector<16x64xf32>
      %cst_85 = arith.constant dense<0.000000e+00> : vector<8x64xf32>
      %185 = tpu.matmul %183, %184, %cst_85 {dimension_numbers = #tpu.dot_dimension_numbers<[1], [0], [0], [1], [0, 0, 1, 1], [], []>} : vector<8x16xf32>, vector<16x64xf32>, vector<8x64xf32> -> vector<8x64xf32>
      %c0_86 = arith.constant 0 : index
      %c0_87 = arith.constant 0 : index
      %186 = vector.load %arg4[%c0_86, %c0_87] : memref<1x64xf32, #tpu.memory_space<vmem>>, vector<1x64xf32>
      %187 = vector.broadcast %186 : vector<1x64xf32> to vector<8x64xf32>
      %188 = arith.addf %185, %187 : vector<8x64xf32>
      %189 = vector.extract_strided_slice %188 {offsets = [0, 0], sizes = [8, 32], strides = [1, 1]} : vector<8x64xf32> to vector<8x32xf32>
      %190 = vector.extract_strided_slice %188 {offsets = [0, 32], sizes = [8, 32], strides = [1, 1]} : vector<8x64xf32> to vector<8x32xf32>
      %191 = arith.negf %190 : vector<8x32xf32>
      %192 = math.exp %191 : vector<8x32xf32>
      %cst_88 = arith.constant 1.000000e+00 : f32
      %193 = vector.broadcast %cst_88 : f32 to vector<8x32xf32>
      %194 = arith.addf %193, %192 : vector<8x32xf32>
      %195 = arith.divf %193, %194 : vector<8x32xf32>
      %196 = arith.mulf %190, %195 : vector<8x32xf32>
      %197 = arith.mulf %189, %196 : vector<8x32xf32>
      %c0_89 = arith.constant 0 : index
      %c0_90 = arith.constant 0 : index
      %198 = vector.load %arg5[%c0_89, %c0_90] : memref<32x32xf32, #tpu.memory_space<vmem>>, vector<32x32xf32>
      %cst_91 = arith.constant dense<0.000000e+00> : vector<8x32xf32>
      %199 = tpu.matmul %197, %198, %cst_91 {dimension_numbers = #tpu.dot_dimension_numbers<[1], [0], [0], [1], [0, 0, 1, 1], [], []>} : vector<8x32xf32>, vector<32x32xf32>, vector<8x32xf32> -> vector<8x32xf32>
      %c0_92 = arith.constant 0 : index
      %c0_93 = arith.constant 0 : index
      %200 = vector.load %arg6[%c0_92, %c0_93] : memref<1x32xf32, #tpu.memory_space<vmem>>, vector<1x32xf32>
      %201 = vector.broadcast %200 : vector<1x32xf32> to vector<8x32xf32>
      %202 = arith.addf %199, %201 : vector<8x32xf32>
      %c0_94 = arith.constant 0 : index
      %c0_95 = arith.constant 0 : index
      %c0_96 = arith.constant 0 : index
      %203 = vector.load %arg15[%c0_94, %c0_95, %c0_96] : memref<1x8x32xf32, #tpu.memory_space<vmem>>, vector<1x8x32xf32>
      %204 = vector.shape_cast %203 : vector<1x8x32xf32> to vector<8x32xf32>
      %205 = vector.shape_cast %202 : vector<8x32xf32> to vector<1x8x32xf32>
      tpu.vector_store %arg15[%c0_94, %c0_95, %c0_96], %205 {strides = array<i32>} : memref<1x8x32xf32, #tpu.memory_space<vmem>>, vector<1x8x32xf32>,
    } else {
    }
    %c0 = arith.constant 0 : index
    %c0_1 = arith.constant 0 : index
    %c0_2 = arith.constant 0 : index
    %3 = vector.load %arg15[%c0, %c0_1, %c0_2] : memref<1x8x32xf32, #tpu.memory_space<vmem>>, vector<1x8x32xf32>
    %4 = vector.shape_cast %3 : vector<1x8x32xf32> to vector<8x32xf32>
    %c0_3 = arith.constant 0 : index
    %c0_4 = arith.constant 0 : index
    %c0_5 = arith.constant 0 : index
    %c0_6 = arith.constant 0 : index
    %5 = vector.load %arg13[%c0_3, %c0_4, %c0_5, %c0_6] : memref<1x5x1x32xf32, #tpu.memory_space<vmem>>, vector<1x1x1x32xf32>
    %6 = vector.shape_cast %5 : vector<1x1x1x32xf32> to vector<1x32xf32>
    %c0_7 = arith.constant 0 : index
    %c1 = arith.constant 1 : index
    %c0_8 = arith.constant 0 : index
    %c0_9 = arith.constant 0 : index
    %7 = vector.load %arg13[%c0_7, %c1, %c0_8, %c0_9] : memref<1x5x1x32xf32, #tpu.memory_space<vmem>>, vector<1x1x1x32xf32>
    %8 = vector.shape_cast %7 : vector<1x1x1x32xf32> to vector<1x32xf32>
    %cst = arith.constant dense<0.000000e+00> : vector<8xf32>
    %9 = vector.multi_reduction <add>, %4, %cst [1] : vector<8x32xf32> to vector<8xf32>
    %10 = vector.shape_cast %9 : vector<8xf32> to vector<8x1xf32>
    %cst_10 = arith.constant 3.200000e+01 : f32
    %11 = vector.broadcast %cst_10 : f32 to vector<8x1xf32>
    %12 = arith.divf %10, %11 : vector<8x1xf32>
    %13 = vector.broadcast %12 : vector<8x1xf32> to vector<8x32xf32>
    %14 = arith.subf %4, %13 : vector<8x32xf32>
    %15 = arith.mulf %14, %14 : vector<8x32xf32>
    %cst_11 = arith.constant dense<0.000000e+00> : vector<8xf32>
    %16 = vector.multi_reduction <add>, %15, %cst_11 [1] : vector<8x32xf32> to vector<8xf32>
    %17 = vector.shape_cast %16 : vector<8xf32> to vector<8x1xf32>
    %cst_12 = arith.constant 3.200000e+01 : f32
    %18 = vector.broadcast %cst_12 : f32 to vector<8x1xf32>
    %19 = arith.divf %17, %18 : vector<8x1xf32>
    %20 = vector.broadcast %12 : vector<8x1xf32> to vector<8x32xf32>
    %21 = arith.subf %4, %20 : vector<8x32xf32>
    %cst_13 = arith.constant 9.99999974E-6 : f32
    %22 = vector.broadcast %cst_13 : f32 to vector<8x1xf32>
    %23 = arith.addf %19, %22 : vector<8x1xf32>
    %24 = math.rsqrt %23 : vector<8x1xf32>
    %25 = vector.broadcast %24 : vector<8x1xf32> to vector<8x32xf32>
    %26 = arith.mulf %21, %25 : vector<8x32xf32>
    %27 = vector.broadcast %6 : vector<1x32xf32> to vector<8x32xf32>
    %28 = arith.mulf %26, %27 : vector<8x32xf32>
    %29 = vector.broadcast %8 : vector<1x32xf32> to vector<8x32xf32>
    %30 = arith.addf %28, %29 : vector<8x32xf32>
    %31 = arith.truncf %30 : vector<8x32xf32> to vector<8x32xbf16>
    %c0_14 = arith.constant 0 : index
    %c0_15 = arith.constant 0 : index
    %c0_16 = arith.constant 0 : index
    %32 = vector.load %arg9[%c0_14, %c0_15, %c0_16] : memref<1x32x160xbf16, #tpu.memory_space<vmem>>, vector<1x32x160xbf16>
    %33 = vector.shape_cast %32 : vector<1x32x160xbf16> to vector<32x160xbf16>
    %cst_17 = arith.constant dense<0.000000e+00> : vector<8x160xf32>
    %34 = tpu.matmul %31, %33, %cst_17 {dimension_numbers = #tpu.dot_dimension_numbers<[1], [0], [0], [1], [0, 0, 1, 1], [], []>} : vector<8x32xbf16>, vector<32x160xbf16>, vector<8x160xf32> -> vector<8x160xf32>
    %35 = vector.extract_strided_slice %34 {offsets = [0, 0], sizes = [8, 32], strides = [1, 1]} : vector<8x160xf32> to vector<8x32xf32>
    %c0_18 = arith.constant 0 : index
    %c0_19 = arith.constant 0 : index
    %c0_20 = arith.constant 0 : index
    %36 = vector.load %arg7[%c0_18, %c0_19, %c0_20] : memref<4x8x32xf32, #tpu.memory_space<vmem>>, vector<1x8x32xf32>
    %37 = vector.shape_cast %36 : vector<1x8x32xf32> to vector<8x32xf32>
    %38 = arith.mulf %35, %37 : vector<8x32xf32>
    %39 = vector.extract_strided_slice %34 {offsets = [0, 32], sizes = [8, 32], strides = [1, 1]} : vector<8x160xf32> to vector<8x32xf32>
    %c1_21 = arith.constant 1 : index
    %c0_22 = arith.constant 0 : index
    %c0_23 = arith.constant 0 : index
    %40 = vector.load %arg7[%c1_21, %c0_22, %c0_23] : memref<4x8x32xf32, #tpu.memory_space<vmem>>, vector<1x8x32xf32>
    %41 = vector.shape_cast %40 : vector<1x8x32xf32> to vector<8x32xf32>
    %42 = arith.mulf %39, %41 : vector<8x32xf32>
    %43 = arith.addf %38, %42 : vector<8x32xf32>
    %44 = vector.extract_strided_slice %34 {offsets = [0, 64], sizes = [8, 32], strides = [1, 1]} : vector<8x160xf32> to vector<8x32xf32>
    %c2 = arith.constant 2 : index
    %c0_24 = arith.constant 0 : index
    %c0_25 = arith.constant 0 : index
    %45 = vector.load %arg7[%c2, %c0_24, %c0_25] : memref<4x8x32xf32, #tpu.memory_space<vmem>>, vector<1x8x32xf32>
    %46 = vector.shape_cast %45 : vector<1x8x32xf32> to vector<8x32xf32>
    %47 = arith.mulf %44, %46 : vector<8x32xf32>
    %48 = vector.extract_strided_slice %34 {offsets = [0, 96], sizes = [8, 32], strides = [1, 1]} : vector<8x160xf32> to vector<8x32xf32>
    %c3 = arith.constant 3 : index
    %c0_26 = arith.constant 0 : index
    %c0_27 = arith.constant 0 : index
    %49 = vector.load %arg7[%c3, %c0_26, %c0_27] : memref<4x8x32xf32, #tpu.memory_space<vmem>>, vector<1x8x32xf32>
    %50 = vector.shape_cast %49 : vector<1x8x32xf32> to vector<8x32xf32>
    %51 = arith.mulf %48, %50 : vector<8x32xf32>
    %52 = arith.addf %47, %51 : vector<8x32xf32>
    %53 = vector.extract_strided_slice %34 {offsets = [0, 128], sizes = [8, 32], strides = [1, 1]} : vector<8x160xf32> to vector<8x32xf32>
    %54 = vector.extract_strided_slice %43 {offsets = [0, 0], sizes = [8, 8], strides = [1, 1]} : vector<8x32xf32> to vector<8x8xf32>
    %55 = vector.extract_strided_slice %52 {offsets = [0, 0], sizes = [8, 8], strides = [1, 1]} : vector<8x32xf32> to vector<8x8xf32>
    %56 = tpu.transpose %55, [1, 0] : vector<8x8xf32> -> vector<8x8xf32>
    %cst_28 = arith.constant dense<0.000000e+00> : vector<8x8xf32>
    %57 = tpu.matmul %54, %56, %cst_28 {dimension_numbers = #tpu.dot_dimension_numbers<[1], [0], [0], [1], [0, 0, 1, 1], [], []>} : vector<8x8xf32>, vector<8x8xf32>, vector<8x8xf32> -> vector<8x8xf32>
    %cst_29 = arith.constant dense<0xFF800000> : vector<8xf32>
    %58 = vector.multi_reduction <maximumf>, %57, %cst_29 [1] : vector<8x8xf32> to vector<8xf32>
    %59 = vector.shape_cast %58 : vector<8xf32> to vector<8x1xf32>
    %60 = vector.broadcast %59 : vector<8x1xf32> to vector<8x8xf32>
    %61 = arith.subf %57, %60 : vector<8x8xf32>
    %62 = math.exp %61 : vector<8x8xf32>
    %cst_30 = arith.constant dense<0.000000e+00> : vector<8xf32>
    %63 = vector.multi_reduction <add>, %62, %cst_30 [1] : vector<8x8xf32> to vector<8xf32>
    %64 = vector.shape_cast %63 : vector<8xf32> to vector<8x1xf32>
    %65 = tpu.reciprocal %64 {approx = true} : vector<8x1xf32> -> vector<8x1xf32>
    %66 = vector.broadcast %65 : vector<8x1xf32> to vector<8x8xf32>
    %67 = arith.mulf %62, %66 : vector<8x8xf32>
    %68 = vector.extract_strided_slice %53 {offsets = [0, 0], sizes = [8, 8], strides = [1, 1]} : vector<8x32xf32> to vector<8x8xf32>
    %cst_31 = arith.constant dense<0.000000e+00> : vector<8x8xf32>
    %69 = tpu.matmul %67, %68, %cst_31 {dimension_numbers = #tpu.dot_dimension_numbers<[1], [0], [0], [1], [0, 0, 1, 1], [], []>} : vector<8x8xf32>, vector<8x8xf32>, vector<8x8xf32> -> vector<8x8xf32>
    %70 = vector.extract_strided_slice %43 {offsets = [0, 8], sizes = [8, 8], strides = [1, 1]} : vector<8x32xf32> to vector<8x8xf32>
    %71 = vector.extract_strided_slice %52 {offsets = [0, 8], sizes = [8, 8], strides = [1, 1]} : vector<8x32xf32> to vector<8x8xf32>
    %72 = tpu.transpose %71, [1, 0] : vector<8x8xf32> -> vector<8x8xf32>
    %cst_32 = arith.constant dense<0.000000e+00> : vector<8x8xf32>
    %73 = tpu.matmul %70, %72, %cst_32 {dimension_numbers = #tpu.dot_dimension_numbers<[1], [0], [0], [1], [0, 0, 1, 1], [], []>} : vector<8x8xf32>, vector<8x8xf32>, vector<8x8xf32> -> vector<8x8xf32>
    %cst_33 = arith.constant dense<0xFF800000> : vector<8xf32>
    %74 = vector.multi_reduction <maximumf>, %73, %cst_33 [1] : vector<8x8xf32> to vector<8xf32>
    %75 = vector.shape_cast %74 : vector<8xf32> to vector<8x1xf32>
    %76 = vector.broadcast %75 : vector<8x1xf32> to vector<8x8xf32>
    %77 = arith.subf %73, %76 : vector<8x8xf32>
    %78 = math.exp %77 : vector<8x8xf32>
    %cst_34 = arith.constant dense<0.000000e+00> : vector<8xf32>
    %79 = vector.multi_reduction <add>, %78, %cst_34 [1] : vector<8x8xf32> to vector<8xf32>
    %80 = vector.shape_cast %79 : vector<8xf32> to vector<8x1xf32>
    %81 = tpu.reciprocal %80 {approx = true} : vector<8x1xf32> -> vector<8x1xf32>
    %82 = vector.broadcast %81 : vector<8x1xf32> to vector<8x8xf32>
    %83 = arith.mulf %78, %82 : vector<8x8xf32>
    %84 = vector.extract_strided_slice %53 {offsets = [0, 8], sizes = [8, 8], strides = [1, 1]} : vector<8x32xf32> to vector<8x8xf32>
    %cst_35 = arith.constant dense<0.000000e+00> : vector<8x8xf32>
    %85 = tpu.matmul %83, %84, %cst_35 {dimension_numbers = #tpu.dot_dimension_numbers<[1], [0], [0], [1], [0, 0, 1, 1], [], []>} : vector<8x8xf32>, vector<8x8xf32>, vector<8x8xf32> -> vector<8x8xf32>
    %86 = vector.extract_strided_slice %43 {offsets = [0, 16], sizes = [8, 8], strides = [1, 1]} : vector<8x32xf32> to vector<8x8xf32>
    %87 = vector.extract_strided_slice %52 {offsets = [0, 16], sizes = [8, 8], strides = [1, 1]} : vector<8x32xf32> to vector<8x8xf32>
    %88 = tpu.transpose %87, [1, 0] : vector<8x8xf32> -> vector<8x8xf32>
    %cst_36 = arith.constant dense<0.000000e+00> : vector<8x8xf32>
    %89 = tpu.matmul %86, %88, %cst_36 {dimension_numbers = #tpu.dot_dimension_numbers<[1], [0], [0], [1], [0, 0, 1, 1], [], []>} : vector<8x8xf32>, vector<8x8xf32>, vector<8x8xf32> -> vector<8x8xf32>
    %cst_37 = arith.constant dense<0xFF800000> : vector<8xf32>
    %90 = vector.multi_reduction <maximumf>, %89, %cst_37 [1] : vector<8x8xf32> to vector<8xf32>
    %91 = vector.shape_cast %90 : vector<8xf32> to vector<8x1xf32>
    %92 = vector.broadcast %91 : vector<8x1xf32> to vector<8x8xf32>
    %93 = arith.subf %89, %92 : vector<8x8xf32>
    %94 = math.exp %93 : vector<8x8xf32>
    %cst_38 = arith.constant dense<0.000000e+00> : vector<8xf32>
    %95 = vector.multi_reduction <add>, %94, %cst_38 [1] : vector<8x8xf32> to vector<8xf32>
    %96 = vector.shape_cast %95 : vector<8xf32> to vector<8x1xf32>
    %97 = tpu.reciprocal %96 {approx = true} : vector<8x1xf32> -> vector<8x1xf32>
    %98 = vector.broadcast %97 : vector<8x1xf32> to vector<8x8xf32>
    %99 = arith.mulf %94, %98 : vector<8x8xf32>
    %100 = vector.extract_strided_slice %53 {offsets = [0, 16], sizes = [8, 8], strides = [1, 1]} : vector<8x32xf32> to vector<8x8xf32>
    %cst_39 = arith.constant dense<0.000000e+00> : vector<8x8xf32>
    %101 = tpu.matmul %99, %100, %cst_39 {dimension_numbers = #tpu.dot_dimension_numbers<[1], [0], [0], [1], [0, 0, 1, 1], [], []>} : vector<8x8xf32>, vector<8x8xf32>, vector<8x8xf32> -> vector<8x8xf32>
    %102 = vector.extract_strided_slice %43 {offsets = [0, 24], sizes = [8, 8], strides = [1, 1]} : vector<8x32xf32> to vector<8x8xf32>
    %103 = vector.extract_strided_slice %52 {offsets = [0, 24], sizes = [8, 8], strides = [1, 1]} : vector<8x32xf32> to vector<8x8xf32>
    %104 = tpu.transpose %103, [1, 0] : vector<8x8xf32> -> vector<8x8xf32>
    %cst_40 = arith.constant dense<0.000000e+00> : vector<8x8xf32>
    %105 = tpu.matmul %102, %104, %cst_40 {dimension_numbers = #tpu.dot_dimension_numbers<[1], [0], [0], [1], [0, 0, 1, 1], [], []>} : vector<8x8xf32>, vector<8x8xf32>, vector<8x8xf32> -> vector<8x8xf32>
    %cst_41 = arith.constant dense<0xFF800000> : vector<8xf32>
    %106 = vector.multi_reduction <maximumf>, %105, %cst_41 [1] : vector<8x8xf32> to vector<8xf32>
    %107 = vector.shape_cast %106 : vector<8xf32> to vector<8x1xf32>
    %108 = vector.broadcast %107 : vector<8x1xf32> to vector<8x8xf32>
    %109 = arith.subf %105, %108 : vector<8x8xf32>
    %110 = math.exp %109 : vector<8x8xf32>
    %cst_42 = arith.constant dense<0.000000e+00> : vector<8xf32>
    %111 = vector.multi_reduction <add>, %110, %cst_42 [1] : vector<8x8xf32> to vector<8xf32>
    %112 = vector.shape_cast %111 : vector<8xf32> to vector<8x1xf32>
    %113 = tpu.reciprocal %112 {approx = true} : vector<8x1xf32> -> vector<8x1xf32>
    %114 = vector.broadcast %113 : vector<8x1xf32> to vector<8x8xf32>
    %115 = arith.mulf %110, %114 : vector<8x8xf32>
    %116 = vector.extract_strided_slice %53 {offsets = [0, 24], sizes = [8, 8], strides = [1, 1]} : vector<8x32xf32> to vector<8x8xf32>
    %cst_43 = arith.constant dense<0.000000e+00> : vector<8x8xf32>
    %117 = tpu.matmul %115, %116, %cst_43 {dimension_numbers = #tpu.dot_dimension_numbers<[1], [0], [0], [1], [0, 0, 1, 1], [], []>} : vector<8x8xf32>, vector<8x8xf32>, vector<8x8xf32> -> vector<8x8xf32>
    %118 = tpu.concatenate %69, %85, %101, %117 in 1 : vector<8x8xf32>, vector<8x8xf32>, vector<8x8xf32>, vector<8x8xf32> -> vector<8x32xf32>
    %119 = arith.truncf %118 : vector<8x32xf32> to vector<8x32xbf16>
    %c0_44 = arith.constant 0 : index
    %c0_45 = arith.constant 0 : index
    %c0_46 = arith.constant 0 : index
    %120 = vector.load %arg10[%c0_44, %c0_45, %c0_46] : memref<1x32x32xbf16, #tpu.memory_space<vmem>>, vector<1x32x32xbf16>
    %121 = vector.shape_cast %120 : vector<1x32x32xbf16> to vector<32x32xbf16>
    %cst_47 = arith.constant dense<0.000000e+00> : vector<8x32xf32>
    %122 = tpu.matmul %119, %121, %cst_47 {dimension_numbers = #tpu.dot_dimension_numbers<[1], [0], [0], [1], [0, 0, 1, 1], [], []>} : vector<8x32xbf16>, vector<32x32xbf16>, vector<8x32xf32> -> vector<8x32xf32>
    %123 = arith.addf %4, %122 : vector<8x32xf32>
    %c0_48 = arith.constant 0 : index
    %c2_49 = arith.constant 2 : index
    %c0_50 = arith.constant 0 : index
    %c0_51 = arith.constant 0 : index
    %124 = vector.load %arg13[%c0_48, %c2_49, %c0_50, %c0_51] : memref<1x5x1x32xf32, #tpu.memory_space<vmem>>, vector<1x1x1x32xf32>
    %125 = vector.shape_cast %124 : vector<1x1x1x32xf32> to vector<1x32xf32>
    %c0_52 = arith.constant 0 : index
    %c3_53 = arith.constant 3 : index
    %c0_54 = arith.constant 0 : index
    %c0_55 = arith.constant 0 : index
    %126 = vector.load %arg13[%c0_52, %c3_53, %c0_54, %c0_55] : memref<1x5x1x32xf32, #tpu.memory_space<vmem>>, vector<1x1x1x32xf32>
    %127 = vector.shape_cast %126 : vector<1x1x1x32xf32> to vector<1x32xf32>
    %cst_56 = arith.constant dense<0.000000e+00> : vector<8xf32>
    %128 = vector.multi_reduction <add>, %123, %cst_56 [1] : vector<8x32xf32> to vector<8xf32>
    %129 = vector.shape_cast %128 : vector<8xf32> to vector<8x1xf32>
    %cst_57 = arith.constant 3.200000e+01 : f32
    %130 = vector.broadcast %cst_57 : f32 to vector<8x1xf32>
    %131 = arith.divf %129, %130 : vector<8x1xf32>
    %132 = vector.broadcast %131 : vector<8x1xf32> to vector<8x32xf32>
    %133 = arith.subf %123, %132 : vector<8x32xf32>
    %134 = arith.mulf %133, %133 : vector<8x32xf32>
    %cst_58 = arith.constant dense<0.000000e+00> : vector<8xf32>
    %135 = vector.multi_reduction <add>, %134, %cst_58 [1] : vector<8x32xf32> to vector<8xf32>
    %136 = vector.shape_cast %135 : vector<8xf32> to vector<8x1xf32>
    %cst_59 = arith.constant 3.200000e+01 : f32
    %137 = vector.broadcast %cst_59 : f32 to vector<8x1xf32>
    %138 = arith.divf %136, %137 : vector<8x1xf32>
    %139 = vector.broadcast %131 : vector<8x1xf32> to vector<8x32xf32>
    %140 = arith.subf %123, %139 : vector<8x32xf32>
    %cst_60 = arith.constant 9.99999974E-6 : f32
    %141 = vector.broadcast %cst_60 : f32 to vector<8x1xf32>
    %142 = arith.addf %138, %141 : vector<8x1xf32>
    %143 = math.rsqrt %142 : vector<8x1xf32>
    %144 = vector.broadcast %143 : vector<8x1xf32> to vector<8x32xf32>
    %145 = arith.mulf %140, %144 : vector<8x32xf32>
    %146 = vector.broadcast %125 : vector<1x32xf32> to vector<8x32xf32>
    %147 = arith.mulf %145, %146 : vector<8x32xf32>
    %148 = vector.broadcast %127 : vector<1x32xf32> to vector<8x32xf32>
    %149 = arith.addf %147, %148 : vector<8x32xf32>
    %150 = arith.truncf %149 : vector<8x32xf32> to vector<8x32xbf16>
    %c0_61 = arith.constant 0 : index
    %c0_62 = arith.constant 0 : index
    %c0_63 = arith.constant 0 : index
    %151 = vector.load %arg11[%c0_61, %c0_62, %c0_63] : memref<1x32x128xbf16, #tpu.memory_space<vmem>>, vector<1x32x128xbf16>
    %152 = vector.shape_cast %151 : vector<1x32x128xbf16> to vector<32x128xbf16>
    %cst_64 = arith.constant dense<0.000000e+00> : vector<8x128xf32>
    %153 = tpu.matmul %150, %152, %cst_64 {dimension_numbers = #tpu.dot_dimension_numbers<[1], [0], [0], [1], [0, 0, 1, 1], [], []>} : vector<8x32xbf16>, vector<32x128xbf16>, vector<8x128xf32> -> vector<8x128xf32>
    %c0_65 = arith.constant 0 : index
    %c0_66 = arith.constant 0 : index
    %c0_67 = arith.constant 0 : index
    %154 = vector.load %arg14[%c0_65, %c0_66, %c0_67] : memref<1x1x128xf32, #tpu.memory_space<vmem>>, vector<1x1x128xf32>
    %155 = vector.shape_cast %154 : vector<1x1x128xf32> to vector<1x128xf32>
    %156 = vector.broadcast %155 : vector<1x128xf32> to vector<8x128xf32>
    %157 = arith.addf %153, %156 : vector<8x128xf32>
    %158 = vector.extract_strided_slice %157 {offsets = [0, 0], sizes = [8, 64], strides = [1, 1]} : vector<8x128xf32> to vector<8x64xf32>
    %159 = vector.extract_strided_slice %157 {offsets = [0, 64], sizes = [8, 64], strides = [1, 1]} : vector<8x128xf32> to vector<8x64xf32>
    %160 = arith.negf %159 : vector<8x64xf32>
    %161 = math.exp %160 : vector<8x64xf32>
    %cst_68 = arith.constant 1.000000e+00 : f32
    %162 = vector.broadcast %cst_68 : f32 to vector<8x64xf32>
    %163 = arith.addf %162, %161 : vector<8x64xf32>
    %164 = arith.divf %162, %163 : vector<8x64xf32>
    %165 = arith.mulf %159, %164 : vector<8x64xf32>
    %166 = arith.mulf %158, %165 : vector<8x64xf32>
    %167 = arith.truncf %166 : vector<8x64xf32> to vector<8x64xbf16>
    %c0_69 = arith.constant 0 : index
    %c0_70 = arith.constant 0 : index
    %c0_71 = arith.constant 0 : index
    %168 = vector.load %arg12[%c0_69, %c0_70, %c0_71] : memref<1x64x32xbf16, #tpu.memory_space<vmem>>, vector<1x64x32xbf16>
    %169 = vector.shape_cast %168 : vector<1x64x32xbf16> to vector<64x32xbf16>
    %cst_72 = arith.constant dense<0.000000e+00> : vector<8x32xf32>
    %170 = tpu.matmul %167, %169, %cst_72 {dimension_numbers = #tpu.dot_dimension_numbers<[1], [0], [0], [1], [0, 0, 1, 1], [], []>} : vector<8x64xbf16>, vector<64x32xbf16>, vector<8x32xf32> -> vector<8x32xf32>
    %171 = arith.addf %123, %170 : vector<8x32xf32>
    %c0_73 = arith.constant 0 : index
    %c4 = arith.constant 4 : index
    %c0_74 = arith.constant 0 : index
    %c0_75 = arith.constant 0 : index
    %172 = vector.load %arg13[%c0_73, %c4, %c0_74, %c0_75] : memref<1x5x1x32xf32, #tpu.memory_space<vmem>>, vector<1x1x1x32xf32>
    %173 = vector.shape_cast %172 : vector<1x1x1x32xf32> to vector<1x32xf32>
    %174 = vector.broadcast %173 : vector<1x32xf32> to vector<8x32xf32>
    %175 = arith.addf %171, %174 : vector<8x32xf32>
    %c0_76 = arith.constant 0 : index
    %c0_77 = arith.constant 0 : index
    %c0_78 = arith.constant 0 : index
    %176 = vector.load %arg15[%c0_76, %c0_77, %c0_78] : memref<1x8x32xf32, #tpu.memory_space<vmem>>, vector<1x8x32xf32>
    %177 = vector.shape_cast %176 : vector<1x8x32xf32> to vector<8x32xf32>
    %178 = vector.shape_cast %175 : vector<8x32xf32> to vector<1x8x32xf32>
    tpu.vector_store %arg15[%c0_76, %c0_77, %c0_78], %178 {strides = array<i32>} : memref<1x8x32xf32, #tpu.memory_space<vmem>>, vector<1x8x32xf32>,
    %c1_i32 = arith.constant 1 : i32
    %179 = arith.cmpi eq, %arg1, %c1_i32 : i32
    %180 = arith.extui %179 : i1 to i32
    %c0_i32_79 = arith.constant 0 : i32
    %181 = arith.cmpi ne, %180, %c0_i32_79 : i32
    scf.if %181 {
      %c0_80 = arith.constant 0 : index
      %c0_81 = arith.constant 0 : index
      %c0_82 = arith.constant 0 : index
      %182 = vector.load %arg15[%c0_80, %c0_81, %c0_82] : memref<1x8x32xf32, #tpu.memory_space<vmem>>, vector<1x8x32xf32>
      %183 = vector.shape_cast %182 : vector<1x8x32xf32> to vector<8x32xf32>
      %c0_83 = arith.constant 0 : index
      %c0_84 = arith.constant 0 : index
      %c0_85 = arith.constant 0 : index
      %184 = vector.load %arg8[%c0_83, %c0_84, %c0_85] : memref<2x1x32xf32, #tpu.memory_space<vmem>>, vector<1x1x32xf32>
      %185 = vector.shape_cast %184 : vector<1x1x32xf32> to vector<1x32xf32>
      %c1_86 = arith.constant 1 : index
      %c0_87 = arith.constant 0 : index
      %c0_88 = arith.constant 0 : index
      %186 = vector.load %arg8[%c1_86, %c0_87, %c0_88] : memref<2x1x32xf32, #tpu.memory_space<vmem>>, vector<1x1x32xf32>
      %187 = vector.shape_cast %186 : vector<1x1x32xf32> to vector<1x32xf32>
      %cst_89 = arith.constant dense<0.000000e+00> : vector<8xf32>
      %188 = vector.multi_reduction <add>, %183, %cst_89 [1] : vector<8x32xf32> to vector<8xf32>
      %189 = vector.shape_cast %188 : vector<8xf32> to vector<8x1xf32>
      %cst_90 = arith.constant 3.200000e+01 : f32
      %190 = vector.broadcast %cst_90 : f32 to vector<8x1xf32>
      %191 = arith.divf %189, %190 : vector<8x1xf32>
      %192 = vector.broadcast %191 : vector<8x1xf32> to vector<8x32xf32>
      %193 = arith.subf %183, %192 : vector<8x32xf32>
      %194 = arith.mulf %193, %193 : vector<8x32xf32>
      %cst_91 = arith.constant dense<0.000000e+00> : vector<8xf32>
      %195 = vector.multi_reduction <add>, %194, %cst_91 [1] : vector<8x32xf32> to vector<8xf32>
      %196 = vector.shape_cast %195 : vector<8xf32> to vector<8x1xf32>
      %cst_92 = arith.constant 3.200000e+01 : f32
      %197 = vector.broadcast %cst_92 : f32 to vector<8x1xf32>
      %198 = arith.divf %196, %197 : vector<8x1xf32>
      %199 = vector.broadcast %191 : vector<8x1xf32> to vector<8x32xf32>
      %200 = arith.subf %183, %199 : vector<8x32xf32>
      %cst_93 = arith.constant 9.99999974E-6 : f32
      %201 = vector.broadcast %cst_93 : f32 to vector<8x1xf32>
      %202 = arith.addf %198, %201 : vector<8x1xf32>
      %203 = math.rsqrt %202 : vector<8x1xf32>
      %204 = vector.broadcast %203 : vector<8x1xf32> to vector<8x32xf32>
      %205 = arith.mulf %200, %204 : vector<8x32xf32>
      %206 = vector.broadcast %185 : vector<1x32xf32> to vector<8x32xf32>
      %207 = arith.mulf %205, %206 : vector<8x32xf32>
      %208 = vector.broadcast %187 : vector<1x32xf32> to vector<8x32xf32>
      %209 = arith.addf %207, %208 : vector<8x32xf32>
      %c0_94 = arith.constant 0 : index
      %c0_95 = arith.constant 0 : index
      %c0_96 = arith.constant 0 : index
      %210 = vector.load %arg15[%c0_94, %c0_95, %c0_96] : memref<1x8x32xf32, #tpu.memory_space<vmem>>, vector<1x8x32xf32>
      %211 = vector.shape_cast %210 : vector<1x8x32xf32> to vector<8x32xf32>
      %212 = vector.shape_cast %209 : vector<8x32xf32> to vector<1x8x32xf32>
      tpu.vector_store %arg15[%c0_94, %c0_95, %c0_96], %212 {strides = array<i32>} : memref<1x8x32xf32, #tpu.memory_space<vmem>>, vector<1x8x32xf32>,
    } else {
    }
    return
  }
  func.func @transform_0(%arg0: i32, %arg1: i32) -> (i32, i32, i32) {
    %c0_i32 = arith.constant 0 : i32
    %c0_i32_0 = arith.constant 0 : i32
    %c0_i32_1 = arith.constant 0 : i32
    return %arg0, %c0_i32, %c0_i32_0 : i32, i32, i32
  }
  func.func @transform_1(%arg0: i32, %arg1: i32) -> (i32, i32) {
    %c0_i32 = arith.constant 0 : i32
    %c0_i32_0 = arith.constant 0 : i32
    %c0_i32_1 = arith.constant 0 : i32
    return %c0_i32, %c0_i32_0 : i32, i32
  }
  func.func @transform_2(%arg0: i32, %arg1: i32) -> (i32, i32) {
    %c0_i32 = arith.constant 0 : i32
    %c0_i32_0 = arith.constant 0 : i32
    %c0_i32_1 = arith.constant 0 : i32
    return %c0_i32, %c0_i32_0 : i32, i32
  }
  func.func @transform_3(%arg0: i32, %arg1: i32) -> (i32, i32) {
    %c0_i32 = arith.constant 0 : i32
    %c0_i32_0 = arith.constant 0 : i32
    %c0_i32_1 = arith.constant 0 : i32
    return %c0_i32, %c0_i32_0 : i32, i32
  }
  func.func @transform_4(%arg0: i32, %arg1: i32) -> (i32, i32) {
    %c0_i32 = arith.constant 0 : i32
    %c0_i32_0 = arith.constant 0 : i32
    %c0_i32_1 = arith.constant 0 : i32
    return %c0_i32, %c0_i32_0 : i32, i32
  }
  func.func @transform_5(%arg0: i32, %arg1: i32) -> (i32, i32, i32) {
    %c0_i32 = arith.constant 0 : i32
    %c0_i32_0 = arith.constant 0 : i32
    %c0_i32_1 = arith.constant 0 : i32
    %c0_i32_2 = arith.constant 0 : i32
    return %c0_i32, %c0_i32_0, %c0_i32_1 : i32, i32, i32
  }
  func.func @transform_6(%arg0: i32, %arg1: i32) -> (i32, i32, i32) {
    %c0_i32 = arith.constant 0 : i32
    %c0_i32_0 = arith.constant 0 : i32
    %c0_i32_1 = arith.constant 0 : i32
    %c0_i32_2 = arith.constant 0 : i32
    return %c0_i32, %c0_i32_0, %c0_i32_1 : i32, i32, i32
  }
  func.func @transform_7(%arg0: i32, %arg1: i32) -> (i32, i32, i32) {
    %c0_i32 = arith.constant 0 : i32
    %c0_i32_0 = arith.constant 0 : i32
    %c0_i32_1 = arith.constant 0 : i32
    return %arg1, %c0_i32, %c0_i32_0 : i32, i32, i32
  }
  func.func @transform_8(%arg0: i32, %arg1: i32) -> (i32, i32, i32) {
    %c0_i32 = arith.constant 0 : i32
    %c0_i32_0 = arith.constant 0 : i32
    %c0_i32_1 = arith.constant 0 : i32
    return %arg1, %c0_i32, %c0_i32_0 : i32, i32, i32
  }
  func.func @transform_9(%arg0: i32, %arg1: i32) -> (i32, i32, i32) {
    %c0_i32 = arith.constant 0 : i32
    %c0_i32_0 = arith.constant 0 : i32
    %c0_i32_1 = arith.constant 0 : i32
    return %arg1, %c0_i32, %c0_i32_0 : i32, i32, i32
  }
  func.func @transform_10(%arg0: i32, %arg1: i32) -> (i32, i32, i32) {
    %c0_i32 = arith.constant 0 : i32
    %c0_i32_0 = arith.constant 0 : i32
    %c0_i32_1 = arith.constant 0 : i32
    return %arg1, %c0_i32, %c0_i32_0 : i32, i32, i32
  }
  func.func @transform_11(%arg0: i32, %arg1: i32) -> (i32, i32, i32, i32) {
    %c0_i32 = arith.constant 0 : i32
    %c0_i32_0 = arith.constant 0 : i32
    %c0_i32_1 = arith.constant 0 : i32
    %c0_i32_2 = arith.constant 0 : i32
    return %arg1, %c0_i32, %c0_i32_0, %c0_i32_1 : i32, i32, i32, i32
  }
  func.func @transform_12(%arg0: i32, %arg1: i32) -> (i32, i32, i32) {
    %c0_i32 = arith.constant 0 : i32
    %c0_i32_0 = arith.constant 0 : i32
    %c0_i32_1 = arith.constant 0 : i32
    return %arg1, %c0_i32, %c0_i32_0 : i32, i32, i32
  }
  func.func @transform_13(%arg0: i32, %arg1: i32) -> (i32, i32, i32) {
    %c0_i32 = arith.constant 0 : i32
    %c0_i32_0 = arith.constant 0 : i32
    %c0_i32_1 = arith.constant 0 : i32
    return %arg0, %c0_i32, %c0_i32_0 : i32, i32, i32
  }
}

</mosaic_0001>

<bundles_post_ra>
// kernel: synthetic_motion_encoder_forward.1
= control target key start
LH: loop header
LB: loop body
LE: loop exit
PB: predicated region body
PF: predicated region fallthrough
CT: control target
= control target key end

     0   :  { %s2169_s0 = inlined_call_operand.vmem [shape: f32[2,8,16], index: 0, kind: input, shape index: {}]   ;;  %s2170_s1 = inlined_call_operand.vmem [shape: f32[16,64], index: 1, kind: input, shape index: {}]   ;;  %s2171_s2 = inlined_call_operand.vmem [shape: f32[1,64], index: 2, kind: input, shape index: {}]   ;;  %s2172_s3 = inlined_call_operand.vmem [shape: f32[32,32], index: 3, kind: input, shape index: {}]   ;;  %s2173_s4 = inlined_call_operand.vmem [shape: f32[1,32], index: 4, kind: input, shape index: {}]   ;;  %s2174_s5 = inlined_call_operand.vmem [shape: f32[4,8,32], index: 5, kind: input, shape index: {}]   ;;  %s2175_s6 = inlined_call_operand.vmem [shape: f32[2,1,32], index: 6, kind: input, shape index: {}]   ;;  %s2176_s7 = inlined_call_operand.vmem [shape: bf16[2,32,160], index: 7, kind: input, shape index: {}]   ;;  %s2177_s8 = inlined_call_operand.vmem [shape: bf16[2,32,32], index: 8, kind: input, shape index: {}]   ;;  %s2178_s9 = inlined_call_operand.vmem [shape: bf16[2,32,128], index: 9, kind: input, shape index: {}]   ;;  %s2179_s10 = inlined_call_operand.vmem [shape: bf16[2,64,32], index: 10, kind: input, shape index: {}]   ;;  %s2180_s11 = inlined_call_operand.vmem [shape: f32[2,5,1,32], index: 11, kind: input, shape index: {}]   ;;  %s2181_s12 = inlined_call_operand.vmem [shape: f32[2,1,128], index: 12, kind: input, shape index: {}]   ;;  %s2182_s13 = inlined_call_operand.hbm [shape: f32[2,8,32], index: 13, kind: output, shape index: {}]  }
   0x1   :  { %2199 = sst [smem:[#allocation17_spill]] %s2169_s0 }
   0x2   :  { %2200 = sst [smem:[#allocation18_spill]] %s2174_s5 }
   0x3   :  { %2201 = sst [smem:[#allocation19_spill]] %s2175_s6 }
   0x4   :  { %2202 = sst [smem:[#allocation20_spill]] %s2176_s7 }
   0x5   :  { %2203 = sst [smem:[#allocation21_spill]] %s2182_s13 }
   0x6   :  { %18 = vsyncpa [#allocation3], 0 }
   0x7   :  { %20 = vsyncpa [#allocation3 + $0x1], 0  ;;  %s1862_s25 = smov 0   ;;  %s1864_s26 = smov 0  }
   0x8   :  { %s1866_s27 = smov 0   ;;  %s1868_s28 = smov 0  }
   0x9   :  { %s1870_s29 = smov 0   ;;  %s1872_s30 = smov 0  }
   0xa   :  { %s1874_s14 = smov 0   ;;  %s1876_s15 = smov 0  }
   0xb LB: > { %2204 = sst [smem:[#allocation5_spill]] %s1748_s25  ;;  %s1440_s16 = sadd.s32 4294967295, %s1776_s15   ;;  %s1776_s15 = sphi %s1876_s15, %s26_s15   ;;  %s1772_s14 = sphi %s1874_s14, %s2237_s14   ;;  %s1768_s30 = sphi %s1872_s30, %s2236_s30   ;;  %s1764_s29 = sphi %s1870_s29, %s2235_s29   ;;  %s1760_s28 = sphi %s1868_s28, %s2234_s28   ;;  %s1756_s27 = sphi %s1866_s27, %s2233_s27   ;;  %s1752_s26 = sphi %s1864_s26, %s2232_s26   ;;  %s1748_s25 = sphi %s1862_s25, %s2231_s25  }
   0xc   : > { %2205 = sst [smem:[#allocation6_spill]] %s1752_s26  ;;  %s1441_s17 = sadd.s32 4294967294, %s1776_s15  }
   0xd   : > { %2206 = sst [smem:[#allocation7_spill]] %s1756_s27  ;;  %s35_s18 = sadd.s32 1, %s1768_s30 }
   0xe   : > { %2207 = sst [smem:[#allocation8_spill]] %s1764_s29  ;;  %p36_p0 = scmp.ge.s32.totalorder %s35_s18, 2 }
   0xf   : > { %2208 = sst [smem:[#allocation9_spill]] %s1768_s30  ;;  %s38_s19 = sadd.s32 1, %s1772_s14 }
  0x10   : > { %2209 = sst [smem:[#allocation10_spill]] %s1772_s14  ;;  %p363_p1 = scmp.ne.s32.totalorder %s1756_s27, %s1752_s26 }
  0x11   : > { %2210 = sst [smem:[#allocation11_spill]] %s1776_s15  ;;  %p364_p2 = scmp.eq.s32.totalorder %s1440_s16, 3 }
  0x12   : > { %s2239_s18 = smov (%p36_p0, %s35_s18), 0  ;;  %s2241_s19 = smov (!%p36_p0, %s38_s19), %s1772_s14 }
  0x13   : > { %2211 = sst [smem:[#allocation12_spill]] %s2239_s18  ;;  %p1911_p3 = por %p364_p2, %p363_p1 }
  0x14   : > { %p369_p4 = scmp.ne.s32.totalorder %s1752_s26, %s1748_s25  ;;  %p40_p5 = scmp.ge.s32.totalorder %s2241_s19, 2 }
  0x15   : > { %s2212_s20 = scalar_select %p1911_p3, 1, 0 }
  0x16   : > { %p370_p6 = scmp.eq.s32.totalorder %s1441_s17, 3  ;;  %p1444_p7 = scmp.ge.s32.totalorder %s1776_s15, 1 }
  0x17   : > { %2213 = sst [smem:[#allocation13_spill]] %s2212_s20  ;;  %p458_p8 = scmp.lt.s32.totalorder %s1776_s15, 5 }
  0x18   : > { %s2243_s19 = smov (%p40_p5, %s2241_s19), 0  ;;  %p1921_p9 = por %p370_p6, %p369_p4 }
  0x19   : > { %2214 = sst [smem:[#allocation14_spill]] %s2243_s19  ;;  %p459_p10 = pnand %p1444_p7, %p458_p8 }
  0x1a   : > { %s2215_s21 = scalar_select %p1921_p9, 1, 0 }
  0x1b   : > { %s350_s22 = ssub.s32 %s1772_s14, %s2243_s19  ;;  %s353_s23 = sadd.s32 1, %s1756_s27 }
  0x1c   : > { %2216 = sst [smem:[#allocation15_spill]] %s2215_s21  ;;  %p351_p11 = scmp.eq.s32.totalorder %s350_s22, 0 }
  0x1d   : > { %462 = sbr.rel (%p459_p10) target bundleno = 3219 (0xc93), region = 72  ;;  %s2189_s16 = sand.u32 (!%p459_p10), 1, %s1752_s26  }
  0x1e   : > { %s1929_s24 = scalar_select %p351_p11, %s1756_s27, %s353_s23  }
  0x1f   : > { %p528_p12 = scmp.lt.s32.totalorder (!%p459_p10), %s1764_s29, 1  ;;  %s1445_s17 = sshll.u32 (!%p459_p10), %s2189_s16, 3 }
  0x20   : > { %2217 = sst [smem:[#allocation16_spill]] %s1929_s24  ;;  %p532_p13 = scmp.lt.s32.totalorder (!%p459_p10), %s1760_s28, 1 }
  0x21   : > { %s2218_s0 = sld [smem:[#allocation17_spill]] (!%p459_p10)  ;;  %s1975_s15 = scalar_lea.vmem (!%p459_p10), [#allocation2], %s1445_s17 }
  0x22   : > { %s529_s18 = scalar_select %p528_p12, %s1764_s29, 1 }
  0x23   : > { %s1938_s30 = scalar_select %p532_p13, %s1760_s28, 1 }
  0x24   : > { %s1446_s22 = sshll.u32 %s529_s18, 3  ;;  %s2219_s7 = sld [smem:[#allocation20_spill]] }
  0x25   : > { %s1538_s24 = sshll.u32 %s1938_s30, 5  ;;  %s1539_s16 = sshll.u32 %s1938_s30, 4 }
  0x26   : > { %s1953_s20 = scalar_lea.vmem %s2177_s8, %s1539_s16  ;;  %s1958_s18 = scalar_lea.vmem %s2178_s9, %s1539_s16 }
  0x27   : > { %s531_s14 = scalar_lea.vmem %s2218_s0, %s1446_s22  ;;  %s1963_s22 = scalar_lea.vmem %s2179_s10, %s1538_s24 }
  0x28   : > { %s1554_s23 = smul.u32 5, %s1938_s30  ;;  %s558_s0 = scalar_lea.vmem %s2181_s12, %s1938_s30 }
  0x29   : > { %p1455_p0 = scmp.ne.s32.totalorder %s1760_s28, 0 }
  0x2a   : > { %s1947_s25 = scalar_lea.vmem %s2219_s7, %s1538_s24  ;;  %s1973_s13 = scalar_lea.vmem %s2180_s11, %s1554_s23 }
  0x2b   : > { %563 = sbr.rel (%p1455_p0) target bundleno = 456 (0x1c8), region = 76 }
  0x30   : > { %v566_v0 = vld [vmem:[%s2170_s1 + $0x8] sm:$0xff]  ;;  %v565_v1 = vld [vmem:[%s2170_s1] sm:$0xff]  ;;  %vm571_vm0 = vcmask 130048   ;;  %v623_v6 = vld [vmem:[%s2172_s3 + $0x18] sm:$0xff]  ;;  %vm628_vm5 = vcmask 261120  }
  0x31   : > { %589 = vmatpush.msra.mxu0 %v566_v0  ;;  %v564_v2 = vld [vmem:[%s531_s14] sm:$0xff]  ;;  %v622_v7 = vld [vmem:[%s2172_s3 + $0x10] sm:$0xff]  ;;  %644 = vmatpush.msra.mxu1 %v623_v6  ;;  %s1778_s14 = smov 96   ;;  %v621_v22 = vld [vmem:[%s2172_s3 + $0x8] sm:$0xff] }
  0x32   : > { %v1640_v3 = vld [vmem:[%s2171_s2] ss:$0 sm:$0xff] }
  0x33   : > { %590 = vmatpush.msra.mxu0 %v565_v1  ;;  %645 = vmatpush.msra.mxu1 %v622_v7  ;;  %v620_v23 = vld [vmem:[%s2172_s3] sm:$0xff] }
  0x34   : > { %1456 = vmatmul.msk.f32.vlgmr.msra.gmra.mxu0 %vm571_vm0, %v564_v2  ;;  %v1641_v26 = vld [vmem:[%s2173_s4] ss:$0 sm:$0xff] }
  0x35   : > { %646 = vmatpush.msra.mxu1 %v621_v22 }
  0x37   : > { %647 = vmatpush.msra.mxu1 %v620_v23 }
  0xb1   : > { %v592_v4 = vpop.f32.mrf.mxu0 }
  0xb2   : > { %v593_v5 = vadd.f32 %v1640_v3, %v592_v4 }
  0xb4   : > { %v1457_v8 = vmul.f32 -1.442695, %v593_v5 }
  0xb6   : > { %1642 = vpow2.f32 %v1457_v8 }
  0xbc   : > { %v1643_v9 = vpop.eup %1642 }
  0xbd   : > { %v598_v10 = vadd.f32 1.0, %v1643_v9 }
  0xbf   : > { %1644 = vrcp.f32 %v598_v10  ;;  %v610_v14 = vand.u32 2147483648, %v598_v10  ;;  %v608_v16 = vand.u32 2147483647, %v598_v10  ;;  %vm604_vm2 = vweird.f32 %v598_v10 }
  0xc1   : > { %v611_v18 = vor.u32 1.1754944e-38, %v610_v14  ;;  %vm609_vm4 = vcmp.eq.f32.partialorder %v608_v16, 8.507059e+37 }
  0xc5   : > { %v1645_v11 = vpop.eup %1644 }
  0xc6   : > { %v600_v12 = vmul.f32 %v1645_v11, %v598_v10  ;;  %vm605_vm1 = vweird.f32 %v1645_v11 }
  0xc7   : > { %vm606_vm3 = vmor %vm604_vm2, %vm605_vm1 }
  0xc8   : > { %v601_v13 = vsub.f32 1.0, %v600_v12 }
  0xca   : > { %v602_v15 = vmul.f32 %v1645_v11, %v601_v13 }
  0xcc   : > { %v603_v17 = vadd.f32 %v1645_v11, %v602_v15 }
  0xce   : > { %v607_v19 = vsel %vm606_vm3, %v1645_v11, %v603_v17 }
  0xcf   : > { %v612_v20 = vsel %vm609_vm4, %v611_v18, %v607_v19 }
  0xd0   : > { %v614_v21 = vmul.f32 %v612_v20, %v593_v5 }
  0xd2   : > { %616 = vrot.lane.b32.xlu0 %v614_v21, %s1778_s14 }
 0x144   : > { %v617_v24 = vpop.permute.xlu0 %616 }
 0x145   : > { %v619_v25 = vmul.f32 %v617_v24, %v593_v5 }
 0x147   : > { %1458 = vmatmul.msk.f32.vlgmr.msra.gmra.mxu1 %vm628_vm5, %v619_v25 }
 0x1c4   : > { %v649_v27 = vpop.f32.mrf.mxu1 }
 0x1c5   : > { %v650_v28 = vadd.f32 %v1641_v26, %v649_v27 }
 0x1c7   : > { %652 = vst.msk [vmem:[%s1975_s15] sm:$0xff] %vm628_vm5, %v650_v28 }
 0x1c8 PF: > { %vm657_vm6 = vcmask 261120   ;;  %v1779_v31 = vmov 32.0   ;;  %v1470_v43 = vld [vmem:[%s1947_s25 + $0x10] sm:$0xf]  ;;  %v1545_v44 = vld [vmem:[%s1947_s25 + $0x14] sm:$0xf0] }
 0x1c9   : > { %1652 = vrcp.f32 %v1779_v31  ;;  %v1544_v45 = vld [vmem:[%s1947_s25 + $0x14] sm:$0xf]  ;;  %v1471_v46 = vor.u32 %v1545_v44, %v1470_v43  ;;  %v1472_v47 = vld [vmem:[%s1947_s25 + $0x18] sm:$0xf0]  ;;  %v1462_v48 = vld [vmem:[%s1947_s25] sm:$0xf] }
 0x1ca   : > { %v1543_v49 = vld [vmem:[%s1947_s25 + $0x4] sm:$0xf0]  ;;  %v1475_v50 = vor.u32 %v1544_v45, %v1472_v47  ;;  %v1542_v51 = vld [vmem:[%s1947_s25 + $0x4] sm:$0xf]  ;;  %v1464_v52 = vld [vmem:[%s1947_s25 + $0x8] sm:$0xf0] }
 0x1cb   : > { %729 = vmatpush.bf16.msra.mxu0 %v1471_v46  ;;  %v1463_v53 = vor.u32 %v1543_v49, %v1462_v48  ;;  %v1467_v54 = vor.u32 %v1542_v51, %v1464_v52  ;;  %s2220_s16 = sld [smem:[#allocation18_spill]]  ;;  %s1780_s17 = smov 96   ;;  %v1646_v2 = vld [vmem:[%s1973_s13] ss:$0 sm:$0xff]  ;;  %v1647_v5 = vld [vmem:[%s1973_s13 + $0x1] ss:$0 sm:$0xff] }
 0x1cc   : > { %742 = vmatpush.bf16.msra.mxu1 %v1475_v50  ;;  %s1781_s23 = smov 64   ;;  %s1782_s21 = smov 32   ;;  %vm785_vm11 = vcmask 64512   ;;  %vm1054_vm12 = vcmask 130048   ;;  %vm1056_vm13 = vcmask 195584   ;;  %vm1221_vm5 = vcmask 523264  }
 0x1cd   : > { %s1783_s26 = smov 56   ;;  %s1784_s24 = smov 120  }
 0x1ce   : > { %v2004_v29 = vld [vmem:[%s1975_s15] sm:$0xff]  ;;  %s1785_s5 = smov 48   ;;  %s1786_s7 = smov 40  }
 0x1cf   : > { %v658_v30 = vsel %vm657_vm6, %v2004_v29, 0.0  ;;  %v1653_v32 = vpop.eup %1652  ;;  %730 = vmatpush.bf16.msra.mxu0 %v1463_v53  ;;  %s1788_s25 = smov 104   ;;  %s1789_s19 = smov 8  }
 0x1d0   : > { %659 = vadd.xlane.f32.xlu0 %v658_v30  ;;  %v662_v33 = vmul.f32 32.0, %v1653_v32  ;;  %vm666_vm7 = vweird.f32 %v1653_v32  ;;  %743 = vmatpush.bf16.msra.mxu1 %v1467_v54  ;;  %s1790_s14 = smov 16   ;;  %s1791_s27 = smov 24  }
 0x1d1   : > { %v1480_v55 = vld [vmem:[%s2220_s16 + $0x18] sm:$0xff]  ;;  %v1479_v59 = vld [vmem:[%s2220_s16 + $0x10] sm:$0xff]  ;;  %v1478_v15 = vld [vmem:[%s2220_s16 + $0x8] sm:$0xff]  ;;  %p1532_p1 = scmp.ne.s32.totalorder %s1760_s28, 1 }
 0x1d2   : > { %v663_v34 = vsub.f32 1.0, %v662_v33  ;;  %773 = vrot.lane.b32.xlu1 %v1480_v55, %s1780_s17  ;;  %v749_v23 = vld [vmem:[%s2220_s16] sm:$0xff]  ;;  %s2221_s30 = sld [smem:[#allocation19_spill]] (!%p1532_p1) }
 0x1d4   : > { %v664_v35 = vmul.f32 %v1653_v32, %v663_v34 }
 0x1d6   : > { %v665_v36 = vadd.f32 %v1653_v32, %v664_v35 }
 0x1d8   : > { %v2008_v37 = vsel %vm666_vm7, %v1653_v32, %v665_v36 }
 0x1da   : > { %766 = vrot.lane.b32.xlu1 %v1479_v59, %s1781_s23 }
 0x243   : > { %v660_v38 = vpop.xlane.xlu0 %659 }
 0x244   : > { %v668_v39 = vmul.f32 %v2008_v37, %v660_v38  ;;  %v774_v9 = vpop.permute.xlu1 %773 }
 0x246   : > { %v669_v40 = vsub.f32 %v2004_v29, %v668_v39 }
 0x248   : > { %v670_v41 = vmul.f32 %v669_v40, %v669_v40 }
 0x24a   : > { %v671_v42 = vsel %vm657_vm6, %v670_v41, 0.0 }
 0x24b   : > { %672 = vadd.xlane.f32.xlu0 %v671_v42 }
 0x24c   : > { %v767_v16 = vpop.permute.xlu1 %766 }
 0x2be   : > { %v673_v56 = vpop.xlane.xlu0 %672 }
 0x2bf   : > { %v674_v57 = vmul.f32 %v673_v56, %v2008_v37 }
 0x2c1   : > { %v675_v58 = vadd.f32 1e-05, %v674_v57 }
 0x2c3   : > { %1654 = vrsqrt.f32 %v675_v58  ;;  %vm682_vm9 = vweird.f32 %v675_v58 }
 0x2c9   : > { %v1655_v60 = vpop.eup %1654 }
 0x2ca   : > { %v677_v61 = vmul.f32 %v1655_v60, %v675_v58  ;;  %vm683_vm8 = vweird.f32 %v1655_v60 }
 0x2cb   : > { %vm684_vm10 = vmor %vm682_vm9, %vm683_vm8 }
 0x2cc   : > { %v678_v62 = vmul.f32 %v1655_v60, %v677_v61 }
 0x2ce   : > { %v679_v63 = vmul.f32 0.5, %v678_v62 }
 0x2d0   : > { %v680_v0 = vsub.f32 1.5, %v679_v63 }
 0x2d2   : > { %v681_v1 = vmul.f32 %v1655_v60, %v680_v0 }
 0x2d4   : > { %v685_v3 = vsel %vm684_vm10, %v1655_v60, %v681_v1 }
 0x2d5   : > { %v686_v4 = vmul.f32 %v685_v3, %v669_v40 }
 0x2d7   : > { %v690_v6 = vmul.f32 %v1646_v2, %v686_v4 }
 0x2d9   : > { %v694_v7 = vadd.f32 %v1647_v5, %v690_v6 }
 0x2db   : > { %v695_v8 = vpack.c.bf16 %v694_v7, %v694_v7 }
 0x2dd   : > { %1476 = vmatmul.msk.bf16.vlgmr.msra.gmra.mxu0 %vm657_vm6, %v695_v8  ;;  %1477 = vmatmul.msk.bf16.vlgmr.msra.gmra.mxu1 %vm657_vm6, %v695_v8 }
 0x35a   : > { %v732_v10 = vpop.f32.mrf.mxu0  ;;  %v2034_v11 = vpop.f32.mrf.mxu1 }
 0x35b   : > { %840 = vmatpush.msra.mxu3 %v2034_v11  ;;  %v776_v12 = vmul.f32 %v774_v9, %v732_v10  ;;  %v769_v17 = vmul.f32 %v767_v16, %v732_v10  ;;  %v750_v24 = vmul.f32 %v749_v23, %v732_v10 }
 0x35d   : > { %778 = vrot.lane.b32.xlu2 %v776_v12, %s1780_s17 }
 0x362   : > { %v734_v13 = vpop.f32.mrf.mxu0  ;;  %v747_v14 = vpop.f32.mrf.mxu1 }
 0x365   : > { %754 = vrot.lane.b32.xlu2 %v1478_v15, %s1782_s21 }
 0x3b7   : > { %v779_v18 = vpop.permute.xlu2 %778 }
 0x3b8   : > { %v781_v19 = vadd.f32 %v779_v18, %v769_v17  ;;  %v1547_v18 = vld [vmem:[%s1953_s20 + $0x8] sm:$0xff] }
 0x3ba   : > { %783 = vrot.lane.b32.xlu0 %v781_v19, %s1781_s23 }
 0x3bf   : > { %v755_v20 = vpop.permute.xlu2 %754 }
 0x3c0   : > { %v757_v21 = vmul.f32 %v755_v20, %v732_v10 }
 0x3c2   : > { %759 = vrot.lane.b32.xlu1 %v757_v21, %s1780_s17  ;;  %847 = vrot.lane.b32.xlu0 %v781_v19, %s1783_s26  ;;  %s1787_s17 = smov 112  }
 0x42c   : > { %v784_v22 = vpop.permute.xlu0 %783 }
 0x42d   : > { %1481 = vmatpush.xpose.msk.msra.mxu2 %vm785_vm11, %v784_v22 }
 0x434   : > { %v760_v25 = vpop.permute.xlu1 %759  ;;  %v848_v26 = vpop.permute.xlu0 %847 }
 0x435   : > { %v762_v27 = vadd.f32 %v760_v25, %v750_v24  ;;  %1484 = vmatpush.xpose.msk.msrb.mxu3 %vm785_vm11, %v848_v26 }
 0x437   : > { %845 = vrot.lane.b32.xlu0 %v762_v27, %s1784_s24  ;;  %1482 = vmatmul.msk.f32.vlgmr.msra.gmra.mxu2 %vm785_vm11, %v762_v27 }
 0x43f   : > { %913 = vrot.lane.b32.xlu0 %v781_v19, %s1785_s5 }
 0x447   : > { %978 = vrot.lane.b32.xlu0 %v781_v19, %s1786_s7  ;;  %v1546_v19 = vld [vmem:[%s1953_s20] sm:$0xff] }
 0x4a9   : > { %v846_v28 = vpop.permute.xlu0 %845 }
 0x4b1   : > { %v914_v30 = vpop.permute.xlu0 %913 }
 0x4b9   : > { %v979_v31 = vpop.permute.xlu0 %978 }
 0x4ba   : > { %v808_v32 = vpop.f32.mrf.mxu2  ;;  %1490 = vmatpush.xpose.msk.msrb.mxu1 %vm785_vm11, %v979_v31 }
 0x4bb   : > { %v811_v33 = vsel %vm785_vm11, %v808_v32, -inf }
 0x4bc   : > { %812 = vmax.xlane.f32.xlu2 %v811_v33 }
 0x4d4   : > { %911 = vrot.lane.b32.xlu2 %v762_v27, %s1787_s17 }
 0x52f   : > { %v813_v34 = vpop.xlane.xlu2 %812 }
 0x530   : > { %v814_v35 = vsub.f32 %v808_v32, %v813_v34 }
 0x532   : > { %v815_v36 = vmul.f32 1.442695, %v814_v35 }
 0x534   : > { %1656 = vpow2.f32 %v815_v36 }
 0x537   : > { %v912_v44 = vpop.permute.xlu2 %911 }
 0x53a   : > { %v1657_v38 = vpop.eup %1656 }
 0x53b   : > { %v817_v39 = vsel %vm785_vm11, %v1657_v38, 0.0 }
 0x53c   : > { %818 = vadd.xlane.f32.xlu1 %v817_v39  ;;  %v1548_v39 = vld [vmem:[%s1958_s18] sm:$0xff] }
 0x555   : > { %976 = vrot.lane.b32.xlu1 %v762_v27, %s1788_s25 }
 0x5af   : > { %v819_v40 = vpop.xlane.xlu1 %818 }
 0x5b0   : > { %1658 = vrcp.f32 %v819_v40 }
 0x5b6   : > { %v1659_v41 = vpop.eup %1658 }
 0x5b7   : > { %v821_v42 = vmul.f32 %v1659_v41, %v1657_v38  ;;  %v1549_v38 = vld [vmem:[%s1958_s18 + $0x8] sm:$0xff] }
 0x5b9   : > { %1483 = vmatmul.msk.f32.vlgmr.msra.gmra.mxu3 %vm785_vm11, %v821_v42 }
 0x5ba   : > { %1487 = vmatpush.xpose.msk.msra.mxu3 %vm785_vm11, %v914_v30 }
 0x5c1   : > { %1485 = vmatmul.msk.f32.vlgmr.msrb.gmra.mxu3 %vm785_vm11, %v846_v28 }
 0x5c2   : > { %1084 = vmatpush.bf16.msrb.mxu3 %v1547_v18 }
 0x5c6   : > { %1085 = vmatpush.bf16.msrb.mxu3 %v1546_v19 }
 0x5c7   : > { %v977_v43 = vpop.permute.xlu1 %976 }
 0x5c8   : > { %1491 = vmatmul.msk.f32.vlgmr.msrb.gmra.mxu1 %vm785_vm11, %v977_v43 }
 0x5c9   : > { %1488 = vmatmul.msk.f32.vlgmr.msra.gmra.mxu3 %vm785_vm11, %v912_v44 }
 0x63c   : > { %v2060_v45 = vpop.f32.mrf.mxu3 }
 0x644   : > { %v870_v46 = vpop.f32.mrf.mxu3 }
 0x645   : > { %v1001_v47 = vpop.f32.mrf.mxu1  ;;  %v873_v48 = vsel %vm785_vm11, %v870_v46, -inf }
 0x646   : > { %874 = vmax.xlane.f32.xlu0 %v873_v48  ;;  %v1004_v49 = vsel %vm785_vm11, %v1001_v47, -inf  ;;  %v1648_v48 = vld [vmem:[%s1973_s13 + $0x2] ss:$0 sm:$0xff] }
 0x647   : > { %1005 = vmax.xlane.f32.xlu1 %v1004_v49 }
 0x64c   : > { %v936_v50 = vpop.f32.mrf.mxu3 }
 0x64d   : > { %v939_v51 = vsel %vm785_vm11, %v936_v50, -inf }
 0x64e   : > { %940 = vmax.xlane.f32.xlu2 %v939_v51  ;;  %v1649_v51 = vld [vmem:[%s1973_s13 + $0x3] ss:$0 sm:$0xff] }
 0x660   : > { %950 = vrot.lane.b32.xlu1 %v2034_v11, %s1787_s17 }
 0x666   : > { %885 = vrot.lane.b32.xlu2 %v2034_v11, %s1784_s24 }
 0x6b9   : > { %v875_v52 = vpop.xlane.xlu0 %874 }
 0x6ba   : > { %v1006_v53 = vpop.xlane.xlu1 %1005  ;;  %v876_v55 = vsub.f32 %v870_v46, %v875_v52 }
 0x6bb   : > { %v1007_v54 = vsub.f32 %v1001_v47, %v1006_v53 }
 0x6bc   : > { %v877_v57 = vmul.f32 1.442695, %v876_v55  ;;  %v1650_v55 = vld [vmem:[%s558_s0] ss:$0 sm:$0xff] }
 0x6bd   : > { %v1008_v56 = vmul.f32 1.442695, %v1007_v54 }
 0x6bf   : > { %1660 = vpow2.f32 %v1008_v56 }
 0x6c0   : > { %1662 = vpow2.f32 %v877_v57 }
 0x6c1   : > { %v941_v58 = vpop.xlane.xlu2 %940 }
 0x6c2   : > { %v942_v60 = vsub.f32 %v936_v50, %v941_v58  ;;  %v1553_v58 = vld [vmem:[%s1963_s22 + $0x18] sm:$0xff] }
 0x6c3   : > { %1229 = vmatpush.bf16.msrb.mxu0 %v1553_v58 }
 0x6c4   : > { %v943_v62 = vmul.f32 1.442695, %v942_v60  ;;  %v1552_v60 = vld [vmem:[%s1963_s22 + $0x10] sm:$0xff] }
 0x6c5   : > { %v1661_v59 = vpop.eup %1660 }
 0x6c6   : > { %v1010_v61 = vsel %vm785_vm11, %v1661_v59, 0.0  ;;  %v1663_v0 = vpop.eup %1662  ;;  %1664 = vpow2.f32 %v943_v62 }
 0x6c7   : > { %1011 = vadd.xlane.f32.xlu0 %v1010_v61  ;;  %v879_v1 = vsel %vm785_vm11, %v1663_v0, 0.0  ;;  %1230 = vmatpush.bf16.msrb.mxu0 %v1552_v60  ;;  %v1551_v61 = vld [vmem:[%s1963_s22 + $0x8] sm:$0xff] }
 0x6c9   : > { %v886_v63 = vpop.permute.xlu2 %885 }
 0x6ca   : > { %906 = vmatpush.msrb.mxu2 %v886_v63 }
 0x6cb   : > { %1231 = vmatpush.bf16.msrb.mxu0 %v1551_v61 }
 0x6cc   : > { %v1665_v3 = vpop.eup %1664 }
 0x6cd   : > { %v945_v4 = vsel %vm785_vm11, %v1665_v3, 0.0 }
 0x6cf   : > { %880 = vadd.xlane.f32.xlu0 %v879_v1 }
 0x6d2   : > { %v951_v2 = vpop.permute.xlu1 %950 }
 0x6d3   : > { %971 = vmatpush.msra.mxu2 %v951_v2 }
 0x6d7   : > { %946 = vadd.xlane.f32.xlu0 %v945_v4 }
 0x6eb   : > { %1015 = vrot.lane.b32.xlu0 %v2034_v11, %s1788_s25 }
 0x73a   : > { %v1012_v5 = vpop.xlane.xlu0 %1011 }
 0x742   : > { %v881_v6 = vpop.xlane.xlu0 %880 }
 0x743   : > { %1666 = vrcp.f32 %v881_v6 }
 0x749   : > { %v1667_v7 = vpop.eup %1666 }
 0x74a   : > { %v947_v8 = vpop.xlane.xlu0 %946  ;;  %v883_v9 = vmul.f32 %v1667_v7, %v1663_v0 }
 0x74b   : > { %1668 = vrcp.f32 %v947_v8 }
 0x74c   : > { %1486 = vmatmul.msk.f32.vlgmr.msrb.gmra.mxu2 %vm785_vm11, %v883_v9  ;;  %1670 = vrcp.f32 %v1012_v5 }
 0x74d   : > { %1156 = vmatpush.bf16.msrb.mxu2 %v1549_v38 }
 0x751   : > { %v1669_v10 = vpop.eup %1668  ;;  %1157 = vmatpush.bf16.msrb.mxu2 %v1548_v39 }
 0x752   : > { %v949_v12 = vmul.f32 %v1669_v10, %v1665_v3  ;;  %v1671_v13 = vpop.eup %1670 }
 0x753   : > { %v1014_v14 = vmul.f32 %v1671_v13, %v1661_v59  ;;  %v1550_v13 = vld [vmem:[%s1963_s22] sm:$0xff]  ;;  %s2222_s22 = smov (!%p1532_p1), %s2221_s30 }
 0x754   : > { %1489 = vmatmul.msk.f32.vlgmr.msra.gmra.mxu2 %vm785_vm11, %v949_v12  ;;  %1232 = vmatpush.bf16.msrb.mxu0 %v1550_v13 }
 0x75d   : > { %v1016_v15 = vpop.permute.xlu0 %1015 }
 0x75e   : > { %1036 = vmatpush.msra.mxu1 %v1016_v15 }
 0x75f   : > { %1492 = vmatmul.msk.f32.vlgmr.msra.gmra.mxu1 %vm785_vm11, %v1014_v14 }
 0x7cf   : > { %v908_v11 = vpop.f32.mrf.mxu2 }
 0x7d0   : > { %1042 = vrot.lane.b32.xlu2 %v908_v11, %s1789_s19 }
 0x7d7   : > { %v973_v16 = vpop.f32.mrf.mxu2 }
 0x7d8   : > { %1046 = vrot.lane.b32.xlu0 %v973_v16, %s1790_s14  ;;  %v1651_v16 = vld [vmem:[%s1973_s13 + $0x4] ss:$0 sm:$0xff] }
 0x7dc   : > { %v1038_v17 = vpop.f32.mrf.mxu1 }
 0x7dd   : > { %1050 = vrot.lane.b32.xlu2 %v1038_v17, %s1791_s27 }
 0x82a   : > { %v1043_v20 = vpop.permute.xlu2 %1042 }
 0x82b   : > { %v1053_v21 = vsel %vm785_vm11, %v2060_v45, %v1043_v20 }
 0x837   : > { %v1051_v23 = vpop.permute.xlu2 %1050 }
 0x84a   : > { %v1047_v22 = vpop.permute.xlu0 %1046 }
 0x84b   : > { %v1055_v24 = vsel %vm1054_vm12, %v1053_v21, %v1047_v22 }
 0x84c   : > { %v1057_v25 = vsel %vm1056_vm13, %v1055_v24, %v1051_v23 }
 0x84d   : > { %v1058_v26 = vpack.c.bf16 %v1057_v25, %v1057_v25 }
 0x84f   : > { %1501 = vmatmul.msk.bf16.vlgmr.msrb.gmra.mxu3 %vm657_vm6, %v1058_v26 }
 0x8d2   : > { %v1087_v27 = vpop.f32.mrf.mxu3 }
 0x8d3   : > { %v2083_v28 = vadd.f32 %v1087_v27, %v2004_v29 }
 0x8d5   : > { %v1096_v30 = vsel %vm657_vm6, %v2083_v28, 0.0 }
 0x8d6   : > { %1097 = vadd.xlane.f32.xlu1 %v1096_v30 }
 0x8da   : > { %v1089_v31 = vpop.f32.mrf.mxu3 }
 0x949   : > { %v1098_v32 = vpop.xlane.xlu1 %1097 }
 0x94a   : > { %v1099_v33 = vmul.f32 %v1098_v32, %v2008_v37 }
 0x94c   : > { %v1100_v34 = vsub.f32 %v2083_v28, %v1099_v33 }
 0x94e   : > { %v1101_v35 = vmul.f32 %v1100_v34, %v1100_v34 }
 0x950   : > { %v1102_v36 = vsel %vm657_vm6, %v1101_v35, 0.0 }
 0x951   : > { %1103 = vadd.xlane.f32.xlu0 %v1102_v36 }
 0x9c4   : > { %v1104_v29 = vpop.xlane.xlu0 %1103 }
 0x9c5   : > { %v1105_v40 = vmul.f32 %v1104_v29, %v2008_v37 }
 0x9c7   : > { %v1106_v41 = vadd.f32 1e-05, %v1105_v40 }
 0x9c9   : > { %1672 = vrsqrt.f32 %v1106_v41  ;;  %vm1113_vm15 = vweird.f32 %v1106_v41 }
 0x9cf   : > { %v1673_v42 = vpop.eup %1672 }
 0x9d0   : > { %v1108_v43 = vmul.f32 %v1673_v42, %v1106_v41  ;;  %vm1114_vm14 = vweird.f32 %v1673_v42 }
 0x9d1   : > { %vm1115_vm0 = vmor %vm1113_vm15, %vm1114_vm14 }
 0x9d2   : > { %v1109_v44 = vmul.f32 %v1673_v42, %v1108_v43 }
 0x9d4   : > { %v1110_v45 = vmul.f32 0.5, %v1109_v44 }
 0x9d6   : > { %v1111_v46 = vsub.f32 1.5, %v1110_v45 }
 0x9d8   : > { %v1112_v47 = vmul.f32 %v1673_v42, %v1111_v46 }
 0x9da   : > { %v1116_v49 = vsel %vm1115_vm0, %v1673_v42, %v1112_v47 }
 0x9db   : > { %v1117_v50 = vmul.f32 %v1116_v49, %v1100_v34 }
 0x9dd   : > { %v1121_v52 = vmul.f32 %v1648_v48, %v1117_v50 }
 0x9df   : > { %v1125_v53 = vadd.f32 %v1649_v51, %v1121_v52 }
 0x9e1   : > { %v1126_v54 = vpack.c.bf16 %v1125_v53, %v1125_v53 }
 0x9e3   : > { %1512 = vmatmul.msk.bf16.vlgmr.msrb.gmra.mxu2 %vm657_vm6, %v1126_v54 }
 0xa66   : > { %v1159_v56 = vpop.f32.mrf.mxu2 }
 0xa67   : > { %v1160_v57 = vadd.f32 %v1650_v55, %v1159_v56 }
 0xa69   : > { %v1513_v59 = vmul.f32 -1.442695, %v1160_v57 }
 0xa6b   : > { %1674 = vpow2.f32 %v1513_v59 }
 0xa6e   : > { %v1161_v62 = vpop.f32.mrf.mxu2 }
 0xa71   : > { %v1675_v63 = vpop.eup %1674 }
 0xa72   : > { %v1166_v0 = vadd.f32 1.0, %v1675_v63 }
 0xa74   : > { %1676 = vrcp.f32 %v1166_v0  ;;  %v1178_v4 = vand.u32 2147483648, %v1166_v0  ;;  %v1176_v6 = vand.u32 2147483647, %v1166_v0  ;;  %vm1172_vm2 = vweird.f32 %v1166_v0 }
 0xa76   : > { %v1179_v8 = vor.u32 1.1754944e-38, %v1178_v4  ;;  %vm1177_vm4 = vcmp.eq.f32.partialorder %v1176_v6, 8.507059e+37 }
 0xa7a   : > { %v1677_v1 = vpop.eup %1676 }
 0xa7b   : > { %v1168_v2 = vmul.f32 %v1677_v1, %v1166_v0  ;;  %vm1173_vm1 = vweird.f32 %v1677_v1 }
 0xa7c   : > { %vm1174_vm3 = vmor %vm1172_vm2, %vm1173_vm1 }
 0xa7d   : > { %v1169_v3 = vsub.f32 1.0, %v1168_v2 }
 0xa7f   : > { %v1170_v5 = vmul.f32 %v1677_v1, %v1169_v3 }
 0xa81   : > { %v1171_v7 = vadd.f32 %v1677_v1, %v1170_v5 }
 0xa83   : > { %v1175_v9 = vsel %vm1174_vm3, %v1677_v1, %v1171_v7 }
 0xa84   : > { %v1180_v10 = vsel %vm1177_vm4, %v1179_v8, %v1175_v9 }
 0xa85   : > { %v1182_v12 = vmul.f32 %v1180_v10, %v1160_v57 }
 0xa87   : > { %1184 = vrot.lane.b32.xlu2 %v1182_v12, %s1781_s23 }
 0xae1   : > { %v1185_v14 = vpop.permute.xlu2 %1184 }
 0xae2   : > { %v1187_v15 = vmul.f32 %v1185_v14, %v1160_v57 }
 0xae4   : > { %v1188_v11 = vpack.c.bf16 %v1187_v15, %v1187_v15 }
 0xae6   : > { %1530 = vmatmul.msk.bf16.vlgmr.msrb.gmra.mxu0 %vm1221_vm5, %v1188_v11 }
 0xb63   : > { %v1234_v17 = vpop.f32.mrf.mxu0 }
 0xb64   : > { %v1238_v18 = vadd.f32 %v1234_v17, %v2083_v28 }
 0xb66   : > { %v1244_v19 = vadd.f32 %v1651_v16, %v1238_v18 }
 0xb67   : > { %1249 = sbr.rel (%p1532_p1) target bundleno = 3197 (0xc7d), region = 80 }
 0xb68   : > { %1245 = vst.msk [vmem:[%s1975_s15] sm:$0xff] %vm657_vm6, %v1244_v19 }
 0xb6b   : > { %v1236_v20 = vpop.f32.mrf.mxu0 }
 0xb6c   : > { %v1678_v39 = vld [vmem:[%s2221_s30] ss:$0 sm:$0xff] }
 0xb6f   : > { %v1250_v21 = vld [vmem:[%s1975_s15] sm:$0xff] }
 0xb70   : > { %v1254_v22 = vsel %vm657_vm6, %v1250_v21, 0.0 }
 0xb71   : > { %1255 = vadd.xlane.f32.xlu0 %v1254_v22 }
 0xbe4   : > { %v1256_v23 = vpop.xlane.xlu0 %1255 }
 0xbe5   : > { %v1257_v24 = vmul.f32 %v1256_v23, %v2008_v37 }
 0xbe7   : > { %v1258_v25 = vsub.f32 %v1250_v21, %v1257_v24 }
 0xbe9   : > { %v1259_v26 = vmul.f32 %v1258_v25, %v1258_v25 }
 0xbeb   : > { %v1260_v27 = vsel %vm657_vm6, %v1259_v26, 0.0 }
 0xbec   : > { %1261 = vadd.xlane.f32.xlu0 %v1260_v27 }
 0xc5f   : > { %v1262_v28 = vpop.xlane.xlu0 %1261 }
 0xc60   : > { %v1263_v30 = vmul.f32 %v1262_v28, %v2008_v37  ;;  %v1679_v37 = vld [vmem:[%s2222_s22 + $0x1] ss:$0 sm:$0xff] }
 0xc62   : > { %v1264_v31 = vadd.f32 1e-05, %v1263_v30 }
 0xc64   : > { %1680 = vrsqrt.f32 %v1264_v31  ;;  %vm1271_vm8 = vweird.f32 %v1264_v31 }
 0xc6a   : > { %v1681_v32 = vpop.eup %1680 }
 0xc6b   : > { %v1266_v33 = vmul.f32 %v1681_v32, %v1264_v31  ;;  %vm1272_vm7 = vweird.f32 %v1681_v32 }
 0xc6c   : > { %vm1273_vm9 = vmor %vm1271_vm8, %vm1272_vm7 }
 0xc6d   : > { %v1267_v34 = vmul.f32 %v1681_v32, %v1266_v33 }
 0xc6f   : > { %v1268_v35 = vmul.f32 0.5, %v1267_v34 }
 0xc71   : > { %v1269_v36 = vsub.f32 1.5, %v1268_v35 }
 0xc73   : > { %v1270_v38 = vmul.f32 %v1681_v32, %v1269_v36 }
 0xc75   : > { %v1274_v29 = vsel %vm1273_vm9, %v1681_v32, %v1270_v38 }
 0xc76   : > { %v1275_v40 = vmul.f32 %v1274_v29, %v1258_v25 }
 0xc78   : > { %v1279_v41 = vmul.f32 %v1678_v39, %v1275_v40 }
 0xc7a   : > { %v1283_v42 = vadd.f32 %v1679_v37, %v1279_v41 }
 0xc7c   : > { %1284 = vst.msk [vmem:[%s1975_s15] sm:$0xff] %vm657_vm6, %v1283_v42 }
 0xc7d PF: > { %s2223_s21 = sld [smem:[#allocation8_spill]]  ;;  %s1298_s25 = sshll.u32 %s1975_s15, 4  ;;  %s1299_s25 = int_to_ptr.vmem [resolvable:$true] %s1298_s25 }
 0xc7e   : > { %s2224_s26 = sld [smem:[#allocation6_spill]] }
 0xc7f   : > { %s2226_s7 = sld [smem:[#allocation21_spill]] }
 0xc83   : > { %s1535_s6 = sshll.u32 %s2223_s21, 3 }
 0xc84   : > { %s2227_s14 = sand.u32 1, %s2224_s26  }
 0xc85   : > { %s1296_s17 = scalar_lea.hbm %s2226_s7, %s1535_s6  ;;  %s1286_s27 = scalar_lea.sflag [#allocation3], %s2227_s14 }
 0xc86   : > { %s1300_s19 = sshll.u32 %s1296_s17, 4  ;;  %s1702_s30 = scalar_lea.hbm %s2226_s7, 16  ;;  %s1301_s19 = int_to_ptr.hbm [resolvable:$true] %s1300_s19 }
 0xc87   : > { %s1696_s20 = sshra.s32 %s1301_s19, 4  ;;  %s1697_s20 = int_to_ptr.hbm [resolvable:$true] %s1696_s20 }
 0xc88   : > { %s1698_s18 = scalar_lea.hbm %s1697_s20, 8  ;;  %p1703_p6 = scmp.lt.s32.totalorder %s1697_s20, %s2226_s7 }
 0xc89   : > { %p1699_p2 = scmp.ne.s32.totalorder %s1697_s20, %s1698_s18  ;;  %p1704_p7 = scmp.lt.s32.totalorder %s1702_s30, %s1698_s18 }
 0xc8b   : > { %p1700_p4 = pnand %p1699_p2, %p1911_p3  ;;  %p1705_p8 = por %p1704_p7, %p1703_p6 }
 0xc8d   : > { %p1701_p5 = pneg %p1700_p4 }
 0xc8f   : > { %p1706_p10 = pnand %p1705_p8, %p1701_p5 }
 0xc91   : > { %1709 = shalt.err (!%p1706_p10)
}
 0xc92   : > { %1555 = dma.vmem_to_hbm [thread:$0]  (%p1911_p3), %s1299_s25, 128, %s1301_s19, %s1286_s27  }
 0xc93 PF: > { %s2228_s15 = sld [smem:[#allocation11_spill]] }
 0xc94   : > { %s2229_s21 = sld [smem:[#allocation5_spill]] }
 0xc99   : > { %p1561_p11 = scmp.ge.s32.totalorder %s2228_s15, 2 }
 0xc9a   : > { %s1312_s6 = sand.u32 1, %s2229_s21  }
 0xc9b   : > { %p1558_p12 = pnand %p1561_p11, %p1921_p9  ;;  %s1313_s24 = scalar_lea.sflag [#allocation3], %s1312_s6 }
 0xc9d   : > { %p1559_p13 = pneg %p1558_p12 }
 0xc9f   : > { %1743 = dma.done.wait (%p1559_p13), %s1313_s24, 128  }
 0xca0   : > { %1745 = vsyncadd (%p1559_p13), %s1313_s24, 4294967168  ;;  %s26_s15 = sadd.s32 1, %s2228_s15   ;;  %s2231_s25 = sld [smem:[#allocation6_spill]] }
 0xca1   : > { %p23_p0 = scmp.ge.s32.totalorder %s26_s15, 6   ;;  %s2232_s26 = sld [smem:[#allocation7_spill]] }
 0xca2   : > { %s2233_s27 = sld [smem:[#allocation16_spill]] }
 0xca3   : > { %s2234_s28 = sld [smem:[#allocation9_spill]]  ;;  %25 = sbr.rel (!%p23_p0) target bundleno = 11 (0xb), region = 141 }
 0xca4   : > { %s2235_s29 = sld [smem:[#allocation10_spill]] }
 0xca5   : > { %s2236_s30 = sld [smem:[#allocation12_spill]] }
 0xca6   : > { %s2237_s14 = sld [smem:[#allocation14_spill]] }
 0xca8   :  { %1319 = vsyncpa [#allocation3], 1 }
 0xca9   :  { %1321 = vsyncpa [#allocation3 + $0x1], 1 }

</bundles_post_ra>
